<compile_context>
chip_gen: v6e
topology: v6e:2x2x1
jax: 0.10.0
libtpu: 0.0.40
codegen_flags: <defaults>
</compile_context>

<pallas_src>
import functools
import math

import jax
import jax.numpy as jnp
from jax.experimental import pallas as pl
from jax.experimental.pallas import tpu as pltpu

LN_EPS = 1e-6

# Row layout of the packed bias / LayerNorm slab (per layer, 16 x 128 f32).
ROW_BQ, ROW_BK, ROW_BV, ROW_BO = 0, 1, 2, 3
ROW_LN1G, ROW_LN1B = 4, 5
ROW_B1, ROW_B2 = 6, 7
ROW_LN2G, ROW_LN2B = 8, 9
# Extra slab index `num_layers` holds the classifier biases:
ROW_FC1B, ROW_FC2B = 0, 1
VEC_ROWS, VEC_LANES = 16, 128


# ----------------------------------------------------------------------------
# Fused forward kernel:
#   one-hot embedding gather + pos add -> L encoder blocks -> mean-pool -> fc1 -> fc2
# ----------------------------------------------------------------------------
def fused_forward_kernel(ids_ref,        # (B*S, 1) int32
                         emb_ref,        # (vocab_pad + max_len, D) bf16 (tok rows, zero pad, pos rows)
                         w_attn_ref,     # (L, 4, D, D) bf16  [Wq, Wk, Wv, Wo]
                         w_ffn_ref,      # (L, D+F, F) bf16   [rows :D -> W1 ; rows D:, :D -> W2]
                         head_w_ref,     # (D+H1, H1) bf16    [rows :D -> fc1_w ; rows D:, :H2 -> fc2_w]
                         vec_ref,        # (L+1, 16, 128) f32 packed biases / LN params
                         out_ref,        # (B, H2) f32
                         *, num_layers, num_heads, batch, seq, pos_offset):
    D = emb_ref.shape[1]
    F = w_ffn_ref.shape[2]
    H1 = head_w_ref.shape[1]
    H2 = out_ref.shape[1]
    BS = batch * seq
    hd = D // num_heads
    scale = 1.0 / math.sqrt(hd)
    n_rows = emb_ref.shape[0]
    bf16 = jnp.bfloat16

    # ---- token embedding gather as a one-hot matmul (in-kernel, no XLA gather) ----
    ids = ids_ref[...]                                                   # (BS, 1) int32
    iota = jax.lax.broadcasted_iota(jnp.int32, (BS, n_rows), 1)
    onehot = jnp.where(iota == ids, 1.0, 0.0).astype(bf16)               # (BS, rows)
    tok = jnp.dot(onehot, emb_ref[...], preferred_element_type=jnp.float32)  # (BS, D)

    # positional embeddings: rows [pos_offset, pos_offset+seq), tiled over batch
    pos = emb_ref[pos_offset:pos_offset + seq, :].astype(jnp.float32)    # (S, D)
    pos = jnp.concatenate([pos] * batch, axis=0)                         # (BS, D)

    xf = tok + pos                                                       # (BS, D) f32

    # ---- encoder blocks (static loop; weights resident in VMEM) ----
    for l in range(num_layers):
        vec = vec_ref[l]                                                 # (16, 128) f32
        bq = vec[ROW_BQ:ROW_BQ + 1, :D]
        bk = vec[ROW_BK:ROW_BK + 1, :D]
        bv = vec[ROW_BV:ROW_BV + 1, :D]
        bo = vec[ROW_BO:ROW_BO + 1, :D]
        g1 = vec[ROW_LN1G:ROW_LN1G + 1, :D]
        be1 = vec[ROW_LN1B:ROW_LN1B + 1, :D]
        b1 = vec[ROW_B1:ROW_B1 + 1, :F]
        b2 = vec[ROW_B2:ROW_B2 + 1, :D]
        g2 = vec[ROW_LN2G:ROW_LN2G + 1, :D]
        be2 = vec[ROW_LN2B:ROW_LN2B + 1, :D]

        xb = xf.astype(bf16)
        q = jnp.dot(xb, w_attn_ref[l, 0], preferred_element_type=jnp.float32) + bq
        k = jnp.dot(xb, w_attn_ref[l, 1], preferred_element_type=jnp.float32) + bk
        v = jnp.dot(xb, w_attn_ref[l, 2], preferred_element_type=jnp.float32) + bv

        # Head split: (BS, D) -> (H*B, S, hd), batch order (h, b). Static lane
        # slices are the inherent data movement at hd=8; the concat is along the
        # leading (major) axis and is cheap.
        def split_heads(t):
            t3 = t.reshape(batch, seq, D)
            return jnp.concatenate(
                [t3[:, :, h * hd:(h + 1) * hd] for h in range(num_heads)],
                axis=0).astype(bf16)
        qh, kh, vh = split_heads(q), split_heads(k), split_heads(v)

        # Batched scaled-dot-product attention over the fused (H*B) batch.
        s_att = jnp.einsum('bqd,bkd->bqk', qh, kh,
                           preferred_element_type=jnp.float32) * scale   # (H*B, S, S)
        s_att = s_att - jnp.max(s_att, axis=-1, keepdims=True)
        p = jnp.exp(s_att)
        inv = pl.reciprocal(jnp.sum(p, axis=-1, keepdims=True), approx=True)
        p = p * inv
        ctx = jnp.einsum('bqk,bkd->bqd', p.astype(bf16), vh,
                         preferred_element_type=jnp.float32)              # (H*B, S, hd)

        # Merge heads back along lanes (column order matches Wo's (h, hd) rows).
        ctx = jnp.concatenate(
            [ctx[h * batch:(h + 1) * batch] for h in range(num_heads)], axis=-1)
        ctx = ctx.reshape(BS, D)

        attn = jnp.dot(ctx.astype(bf16), w_attn_ref[l, 3],
                       preferred_element_type=jnp.float32) + bo
        # dropout_1 is identity in eval mode.

        # Residual + LayerNorm 1 (f32 elementwise)
        h1 = xf + attn
        mu = jnp.mean(h1, axis=-1, keepdims=True)
        var = jnp.mean((h1 - mu) ** 2, axis=-1, keepdims=True)
        h1 = (h1 - mu) * jax.lax.rsqrt(var + LN_EPS) * g1 + be1

        # Feed-forward: Linear -> ReLU -> Linear
        w1 = w_ffn_ref[l, :D, :]                                          # (D, F) bf16
        w2 = w_ffn_ref[l, D:, :D]                                         # (F, D) bf16
        ff = jnp.dot(h1.astype(bf16), w1, preferred_element_type=jnp.float32) + b1
        ff = jnp.maximum(ff, 0.0)
        ff = jnp.dot(ff.astype(bf16), w2, preferred_element_type=jnp.float32) + b2
        # dropout_2 is identity in eval mode.

        # Residual + LayerNorm 2
        h2 = h1 + ff
        mu2 = jnp.mean(h2, axis=-1, keepdims=True)
        var2 = jnp.mean((h2 - mu2) ** 2, axis=-1, keepdims=True)
        xf = (h2 - mu2) * jax.lax.rsqrt(var2 + LN_EPS) * g2 + be2

    # ---- classification head: AvgPool1d(S) over (B,D,S) + squeeze == mean over S ----
    pooled = jnp.mean(xf.reshape(batch, seq, D), axis=1)                  # (B, D)
    hb = vec_ref[num_layers]
    fc1_b = hb[ROW_FC1B:ROW_FC1B + 1, :H1]
    fc2_b = hb[ROW_FC2B:ROW_FC2B + 1, :H2]
    fc1_w = head_w_ref[:D, :]                                             # (D, H1) bf16
    fc2_w = head_w_ref[D:, :H2]                                           # (H1, H2) bf16
    hfc = jnp.dot(pooled.astype(bf16), fc1_w,
                  preferred_element_type=jnp.float32) + fc1_b
    # dropout is identity in eval mode; the module's `relu` is unused in forward.
    out_ref[...] = jnp.dot(hfc.astype(bf16), fc2_w,
                           preferred_element_type=jnp.float32) + fc2_b


# ----------------------------------------------------------------------------
# Wrapper: single pallas_call for the whole forward pass (6 packed inputs).
# ----------------------------------------------------------------------------
def transformer_encoder_cls(x_ids, params, num_heads=4, num_classes=2):
    p = params
    B, S = x_ids.shape
    emb = p["emb"]
    L = p["w_attn"].shape[0]
    pos_offset = emb.shape[0] - S          # pos rows live at the end of the table

    ids2d = x_ids.reshape(B * S, 1).astype(jnp.int32)

    kernel = functools.partial(
        fused_forward_kernel, num_layers=L, num_heads=num_heads,
        batch=B, seq=S, pos_offset=pos_offset)

    def full(shape):
        n = len(shape)
        return pl.BlockSpec(shape, lambda i, n=n: (0,) * n)

    return pl.pallas_call(
        kernel,
        out_shape=jax.ShapeDtypeStruct((B, num_classes), jnp.float32),
        grid=(1,),
        in_specs=[
            full(ids2d.shape),          # token ids (B*S, 1)
            full(p["emb"].shape),       # embedding table (tok + pos rows), bf16
            full(p["w_attn"].shape),    # stacked Wq/Wk/Wv/Wo, bf16
            full(p["w_ffn"].shape),     # stacked W1/W2, bf16
            full(p["head_w"].shape),    # fc1_w / fc2_w slab, bf16
            full(p["vec"].shape),       # packed biases / LN params, f32
        ],
        out_specs=full((B, num_classes)),
        compiler_params=pltpu.CompilerParams(dimension_semantics=("arbitrary",)),
    )(ids2d, p["emb"], p["w_attn"], p["w_ffn"], p["head_w"], p["vec"])


# ----------------------------------------------------------------------------
# Deterministic synthetic parameter init (not a checkpoint load), already in the
# packed layout the kernel expects. Linear weights stored (in_features, out_features).
# ----------------------------------------------------------------------------
def init_params(key, vocab_size, max_length, num_layers, embed_dim, ff_dim,
                num_heads=4, n_hidden=20, n_classes=2):
    D, F, L, H1, H2 = embed_dim, ff_dim, num_layers, n_hidden, n_classes
    ks = jax.random.split(key, 12)

    def w(k, shape, scale=0.05):
        return jax.random.normal(k, shape, jnp.float32) * scale

    # Embedding table: tok rows [0, vocab), zero pad, pos rows at the end.
    vocab_pad = ((vocab_size + 15) // 16) * 16
    tok = w(ks[0], (vocab_size, D), 0.02)
    pos = w(ks[1], (max_length, D), 0.02)
    emb = jnp.zeros((vocab_pad + max_length, D), jnp.float32)
    emb = emb.at[:vocab_size].set(tok).at[vocab_pad:].set(pos)

    # Attention weights: (L, 4, D, D) = [Wq, Wk, Wv, Wo].
    w_attn = jnp.stack([w(ks[2], (L, D, D)), w(ks[3], (L, D, D)),
                        w(ks[4], (L, D, D)), w(ks[5], (L, D, D))], axis=1)

    # FFN weights: rows :D -> W1 (D,F); rows D: (lanes :D) -> W2 (F,D).
    w_ffn = jnp.zeros((L, D + F, F), jnp.float32)
    w_ffn = w_ffn.at[:, :D, :].set(w(ks[6], (L, D, F)))
    w_ffn = w_ffn.at[:, D:, :D].set(w(ks[7], (L, F, D)))

    # Classifier weights: rows :D -> fc1_w (D,H1); rows D: (lanes :H2) -> fc2_w.
    head_w = jnp.zeros((D + H1, H1), jnp.float32)
    head_w = head_w.at[:D, :].set(w(ks[8], (D, H1)))
    head_w = head_w.at[D:, :H2].set(w(ks[9], (H1, H2)))

    # Packed bias / LayerNorm slab: (L+1, 16, 128) f32.
    vec = jnp.zeros((L + 1, VEC_ROWS, VEC_LANES), jnp.float32)
    bias = functools.partial(w, scale=0.01)
    kk = jax.random.split(ks[10], 8)
    vec = vec.at[:L, ROW_BQ, :D].set(bias(kk[0], (L, D)))
    vec = vec.at[:L, ROW_BK, :D].set(bias(kk[1], (L, D)))
    vec = vec.at[:L, ROW_BV, :D].set(bias(kk[2], (L, D)))
    vec = vec.at[:L, ROW_BO, :D].set(bias(kk[3], (L, D)))
    vec = vec.at[:L, ROW_LN1G, :D].set(1.0)
    vec = vec.at[:L, ROW_LN1B, :D].set(bias(kk[4], (L, D)))
    vec = vec.at[:L, ROW_B1, :F].set(bias(kk[5], (L, F)))
    vec = vec.at[:L, ROW_B2, :D].set(bias(kk[6], (L, D)))
    vec = vec.at[:L, ROW_LN2G, :D].set(1.0)
    vec = vec.at[:L, ROW_LN2B, :D].set(bias(kk[7], (L, D)))
    kh = jax.random.split(ks[11], 2)
    vec = vec.at[L, ROW_FC1B, :H1].set(bias(kh[0], (H1,)))
    vec = vec.at[L, ROW_FC2B, :H2].set(bias(kh[1], (H2,)))

    return {
        "emb": emb.astype(jnp.bfloat16),
        "w_attn": w_attn.astype(jnp.bfloat16),
        "w_ffn": w_ffn.astype(jnp.bfloat16),
        "head_w": head_w.astype(jnp.bfloat16),
        "vec": vec,
    }


if __name__ == "__main__":
    # Small shapes consistent with the module's forward.
    vocab_size, max_length, num_layers = 100, 8, 2
    embed_dim, num_heads, ff_dim = 32, 4, 64
    batch = 2   # batch > 1 so .squeeze() keeps the batch axis -> (B, 2)

    key = jax.random.PRNGKey(0)
    pkey, xkey = jax.random.split(key)
    params = init_params(pkey, vocab_size, max_length, num_layers,
                         embed_dim, ff_dim, num_heads=num_heads)
    x_ids = jax.random.randint(xkey, (batch, max_length), 0, vocab_size,
                               dtype=jnp.int32)

    fwd = jax.jit(functools.partial(transformer_encoder_cls,
                                    num_heads=num_heads, num_classes=2))
    out = fwd(x_ids, params)
    out = jax.block_until_ready(out)
    assert out.shape == (batch, 2), out.shape
    assert bool(jnp.all(jnp.isfinite(out)))
    print("KERNEL_OK")
</pallas_src>

<mosaic_0001>
module attributes {stable_mosaic.version = 11 : i64} {
  func.func @fused_forward_kernel(%arg0: i32, %arg1: memref<16x1xi32, #tpu.memory_space<vmem>>, %arg2: memref<120x32xbf16, #tpu.memory_space<vmem>>, %arg3: memref<2x4x32x32xbf16, #tpu.memory_space<vmem>>, %arg4: memref<2x96x64xbf16, #tpu.memory_space<vmem>>, %arg5: memref<52x20xbf16, #tpu.memory_space<vmem>>, %arg6: memref<3x16x128xf32, #tpu.memory_space<vmem>>, %arg7: memref<2x2xf32, #tpu.memory_space<vmem>>) attributes {dimension_semantics = [#tpu.dimension_semantics<arbitrary>], iteration_bounds = array<i64: 1>, scalar_prefetch = 0 : i64, scratch_operands = 0 : i64, tpu.core_type = #tpu.core_type<tc>, window_params = [{pipeline_mode = #tpu.pipeline_mode<synchronous>, transform_indices = @transform_0, window_bounds = array<i64: 16, 1>}, {pipeline_mode = #tpu.pipeline_mode<synchronous>, transform_indices = @transform_1, window_bounds = array<i64: 120, 32>}, {pipeline_mode = #tpu.pipeline_mode<synchronous>, transform_indices = @transform_2, window_bounds = array<i64: 2, 4, 32, 32>}, {pipeline_mode = #tpu.pipeline_mode<synchronous>, transform_indices = @transform_3, window_bounds = array<i64: 2, 96, 64>}, {pipeline_mode = #tpu.pipeline_mode<synchronous>, transform_indices = @transform_4, window_bounds = array<i64: 52, 20>}, {pipeline_mode = #tpu.pipeline_mode<synchronous>, transform_indices = @transform_5, window_bounds = array<i64: 3, 16, 128>}, {pipeline_mode = #tpu.pipeline_mode<synchronous>, transform_indices = @transform_6, window_bounds = array<i64: 2, 2>}]} {
    %c0 = arith.constant 0 : index
    %c0_0 = arith.constant 0 : index
    %0 = vector.load %arg1[%c0, %c0_0] : memref<16x1xi32, #tpu.memory_space<vmem>>, vector<16x1xi32>
    %1 = tpu.iota {dimensions = array<i32: 1>} : vector<16x120xi32>
    %2 = vector.broadcast %0 : vector<16x1xi32> to vector<16x120xi32>
    %3 = arith.cmpi eq, %1, %2 : vector<16x120xi32>
    %cst = arith.constant 1.000000e+00 : f32
    %cst_1 = arith.constant 0.000000e+00 : f32
    %4 = vector.broadcast %cst : f32 to vector<16x120xf32>
    %5 = vector.broadcast %cst_1 : f32 to vector<16x120xf32>
    %6 = arith.select %3, %4, %5 : vector<16x120xi1>, vector<16x120xf32>
    %7 = arith.truncf %6 : vector<16x120xf32> to vector<16x120xbf16>
    %c0_2 = arith.constant 0 : index
    %c0_3 = arith.constant 0 : index
    %8 = vector.load %arg2[%c0_2, %c0_3] : memref<120x32xbf16, #tpu.memory_space<vmem>>, vector<120x32xbf16>
    %cst_4 = arith.constant dense<0.000000e+00> : vector<16x32xf32>
    %9 = tpu.matmul %7, %8, %cst_4 {dimension_numbers = #tpu.dot_dimension_numbers<[1], [0], [0], [1], [0, 0, 1, 1], [], []>} : vector<16x120xbf16>, vector<120x32xbf16>, vector<16x32xf32> -> vector<16x32xf32>
    %c112 = arith.constant 112 : index
    %c0_5 = arith.constant 0 : index
    %10 = vector.load %arg2[%c112, %c0_5] : memref<120x32xbf16, #tpu.memory_space<vmem>>, vector<8x32xbf16>
    %11 = arith.extf %10 : vector<8x32xbf16> to vector<8x32xf32>
    %12 = tpu.concatenate %11, %11 in 0 : vector<8x32xf32>, vector<8x32xf32> -> vector<16x32xf32>
    %13 = arith.addf %9, %12 : vector<16x32xf32>
    %c0_6 = arith.constant 0 : index
    %c0_7 = arith.constant 0 : index
    %c0_8 = arith.constant 0 : index
    %14 = vector.load %arg6[%c0_6, %c0_7, %c0_8] : memref<3x16x128xf32, #tpu.memory_space<vmem>>, vector<1x16x128xf32>
    %15 = vector.shape_cast %14 : vector<1x16x128xf32> to vector<16x128xf32>
    %16 = vector.extract_strided_slice %15 {offsets = [0, 0], sizes = [1, 32], strides = [1, 1]} : vector<16x128xf32> to vector<1x32xf32>
    %17 = vector.extract_strided_slice %15 {offsets = [1, 0], sizes = [1, 32], strides = [1, 1]} : vector<16x128xf32> to vector<1x32xf32>
    %18 = vector.extract_strided_slice %15 {offsets = [2, 0], sizes = [1, 32], strides = [1, 1]} : vector<16x128xf32> to vector<1x32xf32>
    %19 = vector.extract_strided_slice %15 {offsets = [3, 0], sizes = [1, 32], strides = [1, 1]} : vector<16x128xf32> to vector<1x32xf32>
    %20 = vector.extract_strided_slice %15 {offsets = [4, 0], sizes = [1, 32], strides = [1, 1]} : vector<16x128xf32> to vector<1x32xf32>
    %21 = vector.extract_strided_slice %15 {offsets = [5, 0], sizes = [1, 32], strides = [1, 1]} : vector<16x128xf32> to vector<1x32xf32>
    %22 = vector.extract_strided_slice %15 {offsets = [6, 0], sizes = [1, 64], strides = [1, 1]} : vector<16x128xf32> to vector<1x64xf32>
    %23 = vector.extract_strided_slice %15 {offsets = [7, 0], sizes = [1, 32], strides = [1, 1]} : vector<16x128xf32> to vector<1x32xf32>
    %24 = vector.extract_strided_slice %15 {offsets = [8, 0], sizes = [1, 32], strides = [1, 1]} : vector<16x128xf32> to vector<1x32xf32>
    %25 = vector.extract_strided_slice %15 {offsets = [9, 0], sizes = [1, 32], strides = [1, 1]} : vector<16x128xf32> to vector<1x32xf32>
    %26 = arith.truncf %13 : vector<16x32xf32> to vector<16x32xbf16>
    %c0_9 = arith.constant 0 : index
    %c0_10 = arith.constant 0 : index
    %c0_11 = arith.constant 0 : index
    %c0_12 = arith.constant 0 : index
    %27 = vector.load %arg3[%c0_9, %c0_10, %c0_11, %c0_12] : memref<2x4x32x32xbf16, #tpu.memory_space<vmem>>, vector<1x1x32x32xbf16>
    %28 = vector.shape_cast %27 : vector<1x1x32x32xbf16> to vector<32x32xbf16>
    %cst_13 = arith.constant dense<0.000000e+00> : vector<16x32xf32>
    %29 = tpu.matmul %26, %28, %cst_13 {dimension_numbers = #tpu.dot_dimension_numbers<[1], [0], [0], [1], [0, 0, 1, 1], [], []>} : vector<16x32xbf16>, vector<32x32xbf16>, vector<16x32xf32> -> vector<16x32xf32>
    %30 = vector.broadcast %16 : vector<1x32xf32> to vector<16x32xf32>
    %31 = arith.addf %29, %30 : vector<16x32xf32>
    %c0_14 = arith.constant 0 : index
    %c1 = arith.constant 1 : index
    %c0_15 = arith.constant 0 : index
    %c0_16 = arith.constant 0 : index
    %32 = vector.load %arg3[%c0_14, %c1, %c0_15, %c0_16] : memref<2x4x32x32xbf16, #tpu.memory_space<vmem>>, vector<1x1x32x32xbf16>
    %33 = vector.shape_cast %32 : vector<1x1x32x32xbf16> to vector<32x32xbf16>
    %cst_17 = arith.constant dense<0.000000e+00> : vector<16x32xf32>
    %34 = tpu.matmul %26, %33, %cst_17 {dimension_numbers = #tpu.dot_dimension_numbers<[1], [0], [0], [1], [0, 0, 1, 1], [], []>} : vector<16x32xbf16>, vector<32x32xbf16>, vector<16x32xf32> -> vector<16x32xf32>
    %35 = vector.broadcast %17 : vector<1x32xf32> to vector<16x32xf32>
    %36 = arith.addf %34, %35 : vector<16x32xf32>
    %c0_18 = arith.constant 0 : index
    %c2 = arith.constant 2 : index
    %c0_19 = arith.constant 0 : index
    %c0_20 = arith.constant 0 : index
    %37 = vector.load %arg3[%c0_18, %c2, %c0_19, %c0_20] : memref<2x4x32x32xbf16, #tpu.memory_space<vmem>>, vector<1x1x32x32xbf16>
    %38 = vector.shape_cast %37 : vector<1x1x32x32xbf16> to vector<32x32xbf16>
    %cst_21 = arith.constant dense<0.000000e+00> : vector<16x32xf32>
    %39 = tpu.matmul %26, %38, %cst_21 {dimension_numbers = #tpu.dot_dimension_numbers<[1], [0], [0], [1], [0, 0, 1, 1], [], []>} : vector<16x32xbf16>, vector<32x32xbf16>, vector<16x32xf32> -> vector<16x32xf32>
    %40 = vector.broadcast %18 : vector<1x32xf32> to vector<16x32xf32>
    %41 = arith.addf %39, %40 : vector<16x32xf32>
    %42 = vector.shape_cast %31 : vector<16x32xf32> to vector<2x8x32xf32>
    %43 = vector.extract_strided_slice %42 {offsets = [0, 0, 0], sizes = [2, 8, 8], strides = [1, 1, 1]} : vector<2x8x32xf32> to vector<2x8x8xf32>
    %44 = vector.extract_strided_slice %42 {offsets = [0, 0, 8], sizes = [2, 8, 8], strides = [1, 1, 1]} : vector<2x8x32xf32> to vector<2x8x8xf32>
    %45 = vector.extract_strided_slice %42 {offsets = [0, 0, 16], sizes = [2, 8, 8], strides = [1, 1, 1]} : vector<2x8x32xf32> to vector<2x8x8xf32>
    %46 = vector.extract_strided_slice %42 {offsets = [0, 0, 24], sizes = [2, 8, 8], strides = [1, 1, 1]} : vector<2x8x32xf32> to vector<2x8x8xf32>
    %47 = tpu.concatenate %43, %44, %45, %46 in 0 : vector<2x8x8xf32>, vector<2x8x8xf32>, vector<2x8x8xf32>, vector<2x8x8xf32> -> vector<8x8x8xf32>
    %48 = arith.truncf %47 : vector<8x8x8xf32> to vector<8x8x8xbf16>
    %49 = vector.shape_cast %36 : vector<16x32xf32> to vector<2x8x32xf32>
    %50 = vector.extract_strided_slice %49 {offsets = [0, 0, 0], sizes = [2, 8, 8], strides = [1, 1, 1]} : vector<2x8x32xf32> to vector<2x8x8xf32>
    %51 = vector.extract_strided_slice %49 {offsets = [0, 0, 8], sizes = [2, 8, 8], strides = [1, 1, 1]} : vector<2x8x32xf32> to vector<2x8x8xf32>
    %52 = vector.extract_strided_slice %49 {offsets = [0, 0, 16], sizes = [2, 8, 8], strides = [1, 1, 1]} : vector<2x8x32xf32> to vector<2x8x8xf32>
    %53 = vector.extract_strided_slice %49 {offsets = [0, 0, 24], sizes = [2, 8, 8], strides = [1, 1, 1]} : vector<2x8x32xf32> to vector<2x8x8xf32>
    %54 = tpu.concatenate %50, %51, %52, %53 in 0 : vector<2x8x8xf32>, vector<2x8x8xf32>, vector<2x8x8xf32>, vector<2x8x8xf32> -> vector<8x8x8xf32>
    %55 = arith.truncf %54 : vector<8x8x8xf32> to vector<8x8x8xbf16>
    %56 = vector.shape_cast %41 : vector<16x32xf32> to vector<2x8x32xf32>
    %57 = vector.extract_strided_slice %56 {offsets = [0, 0, 0], sizes = [2, 8, 8], strides = [1, 1, 1]} : vector<2x8x32xf32> to vector<2x8x8xf32>
    %58 = vector.extract_strided_slice %56 {offsets = [0, 0, 8], sizes = [2, 8, 8], strides = [1, 1, 1]} : vector<2x8x32xf32> to vector<2x8x8xf32>
    %59 = vector.extract_strided_slice %56 {offsets = [0, 0, 16], sizes = [2, 8, 8], strides = [1, 1, 1]} : vector<2x8x32xf32> to vector<2x8x8xf32>
    %60 = vector.extract_strided_slice %56 {offsets = [0, 0, 24], sizes = [2, 8, 8], strides = [1, 1, 1]} : vector<2x8x32xf32> to vector<2x8x8xf32>
    %61 = tpu.concatenate %57, %58, %59, %60 in 0 : vector<2x8x8xf32>, vector<2x8x8xf32>, vector<2x8x8xf32>, vector<2x8x8xf32> -> vector<8x8x8xf32>
    %62 = arith.truncf %61 : vector<8x8x8xf32> to vector<8x8x8xbf16>
    "tpu.trace_start"() <{level = 10 : i32, message = "bqd,bkd->bqk"}> : () -> ()
    %cst_22 = arith.constant dense<0.000000e+00> : vector<8x8x8xf32>
    %63 = tpu.matmul %48, %55, %cst_22 {dimension_numbers = #tpu.dot_dimension_numbers<[2], [2], [1], [1], [0, 0, 0, 1, 1, 1], [0], [0]>} : vector<8x8x8xbf16>, vector<8x8x8xbf16>, vector<8x8x8xf32> -> vector<8x8x8xf32>
    "tpu.trace_stop"() : () -> ()
    %cst_23 = arith.constant 0.353553385 : f32
    %64 = vector.broadcast %cst_23 : f32 to vector<8x8x8xf32>
    %65 = arith.mulf %63, %64 : vector<8x8x8xf32>
    %cst_24 = arith.constant dense<0xFF800000> : vector<8x8xf32>
    %66 = vector.multi_reduction <maximumf>, %65, %cst_24 [2] : vector<8x8x8xf32> to vector<8x8xf32>
    %67 = vector.shape_cast %66 : vector<8x8xf32> to vector<8x8x1xf32>
    %68 = vector.broadcast %67 : vector<8x8x1xf32> to vector<8x8x8xf32>
    %69 = arith.subf %65, %68 : vector<8x8x8xf32>
    %70 = math.exp %69 : vector<8x8x8xf32>
    %cst_25 = arith.constant dense<0.000000e+00> : vector<8x8xf32>
    %71 = vector.multi_reduction <add>, %70, %cst_25 [2] : vector<8x8x8xf32> to vector<8x8xf32>
    %72 = vector.shape_cast %71 : vector<8x8xf32> to vector<8x8x1xf32>
    %73 = tpu.reciprocal %72 {approx = true} : vector<8x8x1xf32> -> vector<8x8x1xf32>
    %74 = vector.broadcast %73 : vector<8x8x1xf32> to vector<8x8x8xf32>
    %75 = arith.mulf %70, %74 : vector<8x8x8xf32>
    %76 = arith.truncf %75 : vector<8x8x8xf32> to vector<8x8x8xbf16>
    "tpu.trace_start"() <{level = 10 : i32, message = "bqk,bkd->bqd"}> : () -> ()
    %cst_26 = arith.constant dense<0.000000e+00> : vector<8x8x8xf32>
    %77 = tpu.matmul %76, %62, %cst_26 {dimension_numbers = #tpu.dot_dimension_numbers<[2], [1], [1], [2], [0, 0, 0, 1, 1, 2], [0], [0]>} : vector<8x8x8xbf16>, vector<8x8x8xbf16>, vector<8x8x8xf32> -> vector<8x8x8xf32>
    "tpu.trace_stop"() : () -> ()
    %78 = vector.extract_strided_slice %77 {offsets = [0, 0, 0], sizes = [2, 8, 8], strides = [1, 1, 1]} : vector<8x8x8xf32> to vector<2x8x8xf32>
    %79 = vector.extract_strided_slice %77 {offsets = [2, 0, 0], sizes = [2, 8, 8], strides = [1, 1, 1]} : vector<8x8x8xf32> to vector<2x8x8xf32>
    %80 = vector.extract_strided_slice %77 {offsets = [4, 0, 0], sizes = [2, 8, 8], strides = [1, 1, 1]} : vector<8x8x8xf32> to vector<2x8x8xf32>
    %81 = vector.extract_strided_slice %77 {offsets = [6, 0, 0], sizes = [2, 8, 8], strides = [1, 1, 1]} : vector<8x8x8xf32> to vector<2x8x8xf32>
    %82 = tpu.concatenate %78, %79, %80, %81 in 2 : vector<2x8x8xf32>, vector<2x8x8xf32>, vector<2x8x8xf32>, vector<2x8x8xf32> -> vector<2x8x32xf32>
    %83 = vector.shape_cast %82 : vector<2x8x32xf32> to vector<16x32xf32>
    %84 = arith.truncf %83 : vector<16x32xf32> to vector<16x32xbf16>
    %c0_27 = arith.constant 0 : index
    %c3 = arith.constant 3 : index
    %c0_28 = arith.constant 0 : index
    %c0_29 = arith.constant 0 : index
    %85 = vector.load %arg3[%c0_27, %c3, %c0_28, %c0_29] : memref<2x4x32x32xbf16, #tpu.memory_space<vmem>>, vector<1x1x32x32xbf16>
    %86 = vector.shape_cast %85 : vector<1x1x32x32xbf16> to vector<32x32xbf16>
    %cst_30 = arith.constant dense<0.000000e+00> : vector<16x32xf32>
    %87 = tpu.matmul %84, %86, %cst_30 {dimension_numbers = #tpu.dot_dimension_numbers<[1], [0], [0], [1], [0, 0, 1, 1], [], []>} : vector<16x32xbf16>, vector<32x32xbf16>, vector<16x32xf32> -> vector<16x32xf32>
    %88 = vector.broadcast %19 : vector<1x32xf32> to vector<16x32xf32>
    %89 = arith.addf %87, %88 : vector<16x32xf32>
    %90 = arith.addf %13, %89 : vector<16x32xf32>
    %cst_31 = arith.constant dense<0.000000e+00> : vector<16xf32>
    %91 = vector.multi_reduction <add>, %90, %cst_31 [1] : vector<16x32xf32> to vector<16xf32>
    %92 = vector.shape_cast %91 : vector<16xf32> to vector<16x1xf32>
    %cst_32 = arith.constant 3.200000e+01 : f32
    %93 = vector.broadcast %cst_32 : f32 to vector<16x1xf32>
    %94 = arith.divf %92, %93 : vector<16x1xf32>
    %95 = vector.broadcast %94 : vector<16x1xf32> to vector<16x32xf32>
    %96 = arith.subf %90, %95 : vector<16x32xf32>
    %97 = arith.mulf %96, %96 : vector<16x32xf32>
    %cst_33 = arith.constant dense<0.000000e+00> : vector<16xf32>
    %98 = vector.multi_reduction <add>, %97, %cst_33 [1] : vector<16x32xf32> to vector<16xf32>
    %99 = vector.shape_cast %98 : vector<16xf32> to vector<16x1xf32>
    %cst_34 = arith.constant 3.200000e+01 : f32
    %100 = vector.broadcast %cst_34 : f32 to vector<16x1xf32>
    %101 = arith.divf %99, %100 : vector<16x1xf32>
    %102 = vector.broadcast %94 : vector<16x1xf32> to vector<16x32xf32>
    %103 = arith.subf %90, %102 : vector<16x32xf32>
    %cst_35 = arith.constant 9.99999997E-7 : f32
    %104 = vector.broadcast %cst_35 : f32 to vector<16x1xf32>
    %105 = arith.addf %101, %104 : vector<16x1xf32>
    %106 = math.rsqrt %105 : vector<16x1xf32>
    %107 = vector.broadcast %106 : vector<16x1xf32> to vector<16x32xf32>
    %108 = arith.mulf %103, %107 : vector<16x32xf32>
    %109 = vector.broadcast %20 : vector<1x32xf32> to vector<16x32xf32>
    %110 = arith.mulf %108, %109 : vector<16x32xf32>
    %111 = vector.broadcast %21 : vector<1x32xf32> to vector<16x32xf32>
    %112 = arith.addf %110, %111 : vector<16x32xf32>
    %c0_36 = arith.constant 0 : index
    %c0_37 = arith.constant 0 : index
    %c0_38 = arith.constant 0 : index
    %113 = vector.load %arg4[%c0_36, %c0_37, %c0_38] : memref<2x96x64xbf16, #tpu.memory_space<vmem>>, vector<1x32x64xbf16>
    %114 = vector.shape_cast %113 : vector<1x32x64xbf16> to vector<32x64xbf16>
    %c0_39 = arith.constant 0 : index
    %c32 = arith.constant 32 : index
    %c0_40 = arith.constant 0 : index
    %115 = vector.load %arg4[%c0_39, %c32, %c0_40] : memref<2x96x64xbf16, #tpu.memory_space<vmem>>, vector<1x64x32xbf16>
    %116 = vector.shape_cast %115 : vector<1x64x32xbf16> to vector<64x32xbf16>
    %117 = arith.truncf %112 : vector<16x32xf32> to vector<16x32xbf16>
    %cst_41 = arith.constant dense<0.000000e+00> : vector<16x64xf32>
    %118 = tpu.matmul %117, %114, %cst_41 {dimension_numbers = #tpu.dot_dimension_numbers<[1], [0], [0], [1], [0, 0, 1, 1], [], []>} : vector<16x32xbf16>, vector<32x64xbf16>, vector<16x64xf32> -> vector<16x64xf32>
    %119 = vector.broadcast %22 : vector<1x64xf32> to vector<16x64xf32>
    %120 = arith.addf %118, %119 : vector<16x64xf32>
    %cst_42 = arith.constant 0.000000e+00 : f32
    %121 = vector.broadcast %cst_42 : f32 to vector<16x64xf32>
    %122 = arith.maximumf %120, %121 : vector<16x64xf32>
    %123 = arith.truncf %122 : vector<16x64xf32> to vector<16x64xbf16>
    %cst_43 = arith.constant dense<0.000000e+00> : vector<16x32xf32>
    %124 = tpu.matmul %123, %116, %cst_43 {dimension_numbers = #tpu.dot_dimension_numbers<[1], [0], [0], [1], [0, 0, 1, 1], [], []>} : vector<16x64xbf16>, vector<64x32xbf16>, vector<16x32xf32> -> vector<16x32xf32>
    %125 = vector.broadcast %23 : vector<1x32xf32> to vector<16x32xf32>
    %126 = arith.addf %124, %125 : vector<16x32xf32>
    %127 = arith.addf %112, %126 : vector<16x32xf32>
    %cst_44 = arith.constant dense<0.000000e+00> : vector<16xf32>
    %128 = vector.multi_reduction <add>, %127, %cst_44 [1] : vector<16x32xf32> to vector<16xf32>
    %129 = vector.shape_cast %128 : vector<16xf32> to vector<16x1xf32>
    %cst_45 = arith.constant 3.200000e+01 : f32
    %130 = vector.broadcast %cst_45 : f32 to vector<16x1xf32>
    %131 = arith.divf %129, %130 : vector<16x1xf32>
    %132 = vector.broadcast %131 : vector<16x1xf32> to vector<16x32xf32>
    %133 = arith.subf %127, %132 : vector<16x32xf32>
    %134 = arith.mulf %133, %133 : vector<16x32xf32>
    %cst_46 = arith.constant dense<0.000000e+00> : vector<16xf32>
    %135 = vector.multi_reduction <add>, %134, %cst_46 [1] : vector<16x32xf32> to vector<16xf32>
    %136 = vector.shape_cast %135 : vector<16xf32> to vector<16x1xf32>
    %cst_47 = arith.constant 3.200000e+01 : f32
    %137 = vector.broadcast %cst_47 : f32 to vector<16x1xf32>
    %138 = arith.divf %136, %137 : vector<16x1xf32>
    %139 = vector.broadcast %131 : vector<16x1xf32> to vector<16x32xf32>
    %140 = arith.subf %127, %139 : vector<16x32xf32>
    %cst_48 = arith.constant 9.99999997E-7 : f32
    %141 = vector.broadcast %cst_48 : f32 to vector<16x1xf32>
    %142 = arith.addf %138, %141 : vector<16x1xf32>
    %143 = math.rsqrt %142 : vector<16x1xf32>
    %144 = vector.broadcast %143 : vector<16x1xf32> to vector<16x32xf32>
    %145 = arith.mulf %140, %144 : vector<16x32xf32>
    %146 = vector.broadcast %24 : vector<1x32xf32> to vector<16x32xf32>
    %147 = arith.mulf %145, %146 : vector<16x32xf32>
    %148 = vector.broadcast %25 : vector<1x32xf32> to vector<16x32xf32>
    %149 = arith.addf %147, %148 : vector<16x32xf32>
    %c1_49 = arith.constant 1 : index
    %c0_50 = arith.constant 0 : index
    %c0_51 = arith.constant 0 : index
    %150 = vector.load %arg6[%c1_49, %c0_50, %c0_51] : memref<3x16x128xf32, #tpu.memory_space<vmem>>, vector<1x16x128xf32>
    %151 = vector.shape_cast %150 : vector<1x16x128xf32> to vector<16x128xf32>
    %152 = vector.extract_strided_slice %151 {offsets = [0, 0], sizes = [1, 32], strides = [1, 1]} : vector<16x128xf32> to vector<1x32xf32>
    %153 = vector.extract_strided_slice %151 {offsets = [1, 0], sizes = [1, 32], strides = [1, 1]} : vector<16x128xf32> to vector<1x32xf32>
    %154 = vector.extract_strided_slice %151 {offsets = [2, 0], sizes = [1, 32], strides = [1, 1]} : vector<16x128xf32> to vector<1x32xf32>
    %155 = vector.extract_strided_slice %151 {offsets = [3, 0], sizes = [1, 32], strides = [1, 1]} : vector<16x128xf32> to vector<1x32xf32>
    %156 = vector.extract_strided_slice %151 {offsets = [4, 0], sizes = [1, 32], strides = [1, 1]} : vector<16x128xf32> to vector<1x32xf32>
    %157 = vector.extract_strided_slice %151 {offsets = [5, 0], sizes = [1, 32], strides = [1, 1]} : vector<16x128xf32> to vector<1x32xf32>
    %158 = vector.extract_strided_slice %151 {offsets = [6, 0], sizes = [1, 64], strides = [1, 1]} : vector<16x128xf32> to vector<1x64xf32>
    %159 = vector.extract_strided_slice %151 {offsets = [7, 0], sizes = [1, 32], strides = [1, 1]} : vector<16x128xf32> to vector<1x32xf32>
    %160 = vector.extract_strided_slice %151 {offsets = [8, 0], sizes = [1, 32], strides = [1, 1]} : vector<16x128xf32> to vector<1x32xf32>
    %161 = vector.extract_strided_slice %151 {offsets = [9, 0], sizes = [1, 32], strides = [1, 1]} : vector<16x128xf32> to vector<1x32xf32>
    %162 = arith.truncf %149 : vector<16x32xf32> to vector<16x32xbf16>
    %c1_52 = arith.constant 1 : index
    %c0_53 = arith.constant 0 : index
    %c0_54 = arith.constant 0 : index
    %c0_55 = arith.constant 0 : index
    %163 = vector.load %arg3[%c1_52, %c0_53, %c0_54, %c0_55] : memref<2x4x32x32xbf16, #tpu.memory_space<vmem>>, vector<1x1x32x32xbf16>
    %164 = vector.shape_cast %163 : vector<1x1x32x32xbf16> to vector<32x32xbf16>
    %cst_56 = arith.constant dense<0.000000e+00> : vector<16x32xf32>
    %165 = tpu.matmul %162, %164, %cst_56 {dimension_numbers = #tpu.dot_dimension_numbers<[1], [0], [0], [1], [0, 0, 1, 1], [], []>} : vector<16x32xbf16>, vector<32x32xbf16>, vector<16x32xf32> -> vector<16x32xf32>
    %166 = vector.broadcast %152 : vector<1x32xf32> to vector<16x32xf32>
    %167 = arith.addf %165, %166 : vector<16x32xf32>
    %c1_57 = arith.constant 1 : index
    %c1_58 = arith.constant 1 : index
    %c0_59 = arith.constant 0 : index
    %c0_60 = arith.constant 0 : index
    %168 = vector.load %arg3[%c1_57, %c1_58, %c0_59, %c0_60] : memref<2x4x32x32xbf16, #tpu.memory_space<vmem>>, vector<1x1x32x32xbf16>
    %169 = vector.shape_cast %168 : vector<1x1x32x32xbf16> to vector<32x32xbf16>
    %cst_61 = arith.constant dense<0.000000e+00> : vector<16x32xf32>
    %170 = tpu.matmul %162, %169, %cst_61 {dimension_numbers = #tpu.dot_dimension_numbers<[1], [0], [0], [1], [0, 0, 1, 1], [], []>} : vector<16x32xbf16>, vector<32x32xbf16>, vector<16x32xf32> -> vector<16x32xf32>
    %171 = vector.broadcast %153 : vector<1x32xf32> to vector<16x32xf32>
    %172 = arith.addf %170, %171 : vector<16x32xf32>
    %c1_62 = arith.constant 1 : index
    %c2_63 = arith.constant 2 : index
    %c0_64 = arith.constant 0 : index
    %c0_65 = arith.constant 0 : index
    %173 = vector.load %arg3[%c1_62, %c2_63, %c0_64, %c0_65] : memref<2x4x32x32xbf16, #tpu.memory_space<vmem>>, vector<1x1x32x32xbf16>
    %174 = vector.shape_cast %173 : vector<1x1x32x32xbf16> to vector<32x32xbf16>
    %cst_66 = arith.constant dense<0.000000e+00> : vector<16x32xf32>
    %175 = tpu.matmul %162, %174, %cst_66 {dimension_numbers = #tpu.dot_dimension_numbers<[1], [0], [0], [1], [0, 0, 1, 1], [], []>} : vector<16x32xbf16>, vector<32x32xbf16>, vector<16x32xf32> -> vector<16x32xf32>
    %176 = vector.broadcast %154 : vector<1x32xf32> to vector<16x32xf32>
    %177 = arith.addf %175, %176 : vector<16x32xf32>
    %178 = vector.shape_cast %167 : vector<16x32xf32> to vector<2x8x32xf32>
    %179 = vector.extract_strided_slice %178 {offsets = [0, 0, 0], sizes = [2, 8, 8], strides = [1, 1, 1]} : vector<2x8x32xf32> to vector<2x8x8xf32>
    %180 = vector.extract_strided_slice %178 {offsets = [0, 0, 8], sizes = [2, 8, 8], strides = [1, 1, 1]} : vector<2x8x32xf32> to vector<2x8x8xf32>
    %181 = vector.extract_strided_slice %178 {offsets = [0, 0, 16], sizes = [2, 8, 8], strides = [1, 1, 1]} : vector<2x8x32xf32> to vector<2x8x8xf32>
    %182 = vector.extract_strided_slice %178 {offsets = [0, 0, 24], sizes = [2, 8, 8], strides = [1, 1, 1]} : vector<2x8x32xf32> to vector<2x8x8xf32>
    %183 = tpu.concatenate %179, %180, %181, %182 in 0 : vector<2x8x8xf32>, vector<2x8x8xf32>, vector<2x8x8xf32>, vector<2x8x8xf32> -> vector<8x8x8xf32>
    %184 = arith.truncf %183 : vector<8x8x8xf32> to vector<8x8x8xbf16>
    %185 = vector.shape_cast %172 : vector<16x32xf32> to vector<2x8x32xf32>
    %186 = vector.extract_strided_slice %185 {offsets = [0, 0, 0], sizes = [2, 8, 8], strides = [1, 1, 1]} : vector<2x8x32xf32> to vector<2x8x8xf32>
    %187 = vector.extract_strided_slice %185 {offsets = [0, 0, 8], sizes = [2, 8, 8], strides = [1, 1, 1]} : vector<2x8x32xf32> to vector<2x8x8xf32>
    %188 = vector.extract_strided_slice %185 {offsets = [0, 0, 16], sizes = [2, 8, 8], strides = [1, 1, 1]} : vector<2x8x32xf32> to vector<2x8x8xf32>
    %189 = vector.extract_strided_slice %185 {offsets = [0, 0, 24], sizes = [2, 8, 8], strides = [1, 1, 1]} : vector<2x8x32xf32> to vector<2x8x8xf32>
    %190 = tpu.concatenate %186, %187, %188, %189 in 0 : vector<2x8x8xf32>, vector<2x8x8xf32>, vector<2x8x8xf32>, vector<2x8x8xf32> -> vector<8x8x8xf32>
    %191 = arith.truncf %190 : vector<8x8x8xf32> to vector<8x8x8xbf16>
    %192 = vector.shape_cast %177 : vector<16x32xf32> to vector<2x8x32xf32>
    %193 = vector.extract_strided_slice %192 {offsets = [0, 0, 0], sizes = [2, 8, 8], strides = [1, 1, 1]} : vector<2x8x32xf32> to vector<2x8x8xf32>
    %194 = vector.extract_strided_slice %192 {offsets = [0, 0, 8], sizes = [2, 8, 8], strides = [1, 1, 1]} : vector<2x8x32xf32> to vector<2x8x8xf32>
    %195 = vector.extract_strided_slice %192 {offsets = [0, 0, 16], sizes = [2, 8, 8], strides = [1, 1, 1]} : vector<2x8x32xf32> to vector<2x8x8xf32>
    %196 = vector.extract_strided_slice %192 {offsets = [0, 0, 24], sizes = [2, 8, 8], strides = [1, 1, 1]} : vector<2x8x32xf32> to vector<2x8x8xf32>
    %197 = tpu.concatenate %193, %194, %195, %196 in 0 : vector<2x8x8xf32>, vector<2x8x8xf32>, vector<2x8x8xf32>, vector<2x8x8xf32> -> vector<8x8x8xf32>
    %198 = arith.truncf %197 : vector<8x8x8xf32> to vector<8x8x8xbf16>
    "tpu.trace_start"() <{level = 10 : i32, message = "bqd,bkd->bqk"}> : () -> ()
    %cst_67 = arith.constant dense<0.000000e+00> : vector<8x8x8xf32>
    %199 = tpu.matmul %184, %191, %cst_67 {dimension_numbers = #tpu.dot_dimension_numbers<[2], [2], [1], [1], [0, 0, 0, 1, 1, 1], [0], [0]>} : vector<8x8x8xbf16>, vector<8x8x8xbf16>, vector<8x8x8xf32> -> vector<8x8x8xf32>
    "tpu.trace_stop"() : () -> ()
    %cst_68 = arith.constant 0.353553385 : f32
    %200 = vector.broadcast %cst_68 : f32 to vector<8x8x8xf32>
    %201 = arith.mulf %199, %200 : vector<8x8x8xf32>
    %cst_69 = arith.constant dense<0xFF800000> : vector<8x8xf32>
    %202 = vector.multi_reduction <maximumf>, %201, %cst_69 [2] : vector<8x8x8xf32> to vector<8x8xf32>
    %203 = vector.shape_cast %202 : vector<8x8xf32> to vector<8x8x1xf32>
    %204 = vector.broadcast %203 : vector<8x8x1xf32> to vector<8x8x8xf32>
    %205 = arith.subf %201, %204 : vector<8x8x8xf32>
    %206 = math.exp %205 : vector<8x8x8xf32>
    %cst_70 = arith.constant dense<0.000000e+00> : vector<8x8xf32>
    %207 = vector.multi_reduction <add>, %206, %cst_70 [2] : vector<8x8x8xf32> to vector<8x8xf32>
    %208 = vector.shape_cast %207 : vector<8x8xf32> to vector<8x8x1xf32>
    %209 = tpu.reciprocal %208 {approx = true} : vector<8x8x1xf32> -> vector<8x8x1xf32>
    %210 = vector.broadcast %209 : vector<8x8x1xf32> to vector<8x8x8xf32>
    %211 = arith.mulf %206, %210 : vector<8x8x8xf32>
    %212 = arith.truncf %211 : vector<8x8x8xf32> to vector<8x8x8xbf16>
    "tpu.trace_start"() <{level = 10 : i32, message = "bqk,bkd->bqd"}> : () -> ()
    %cst_71 = arith.constant dense<0.000000e+00> : vector<8x8x8xf32>
    %213 = tpu.matmul %212, %198, %cst_71 {dimension_numbers = #tpu.dot_dimension_numbers<[2], [1], [1], [2], [0, 0, 0, 1, 1, 2], [0], [0]>} : vector<8x8x8xbf16>, vector<8x8x8xbf16>, vector<8x8x8xf32> -> vector<8x8x8xf32>
    "tpu.trace_stop"() : () -> ()
    %214 = vector.extract_strided_slice %213 {offsets = [0, 0, 0], sizes = [2, 8, 8], strides = [1, 1, 1]} : vector<8x8x8xf32> to vector<2x8x8xf32>
    %215 = vector.extract_strided_slice %213 {offsets = [2, 0, 0], sizes = [2, 8, 8], strides = [1, 1, 1]} : vector<8x8x8xf32> to vector<2x8x8xf32>
    %216 = vector.extract_strided_slice %213 {offsets = [4, 0, 0], sizes = [2, 8, 8], strides = [1, 1, 1]} : vector<8x8x8xf32> to vector<2x8x8xf32>
    %217 = vector.extract_strided_slice %213 {offsets = [6, 0, 0], sizes = [2, 8, 8], strides = [1, 1, 1]} : vector<8x8x8xf32> to vector<2x8x8xf32>
    %218 = tpu.concatenate %214, %215, %216, %217 in 2 : vector<2x8x8xf32>, vector<2x8x8xf32>, vector<2x8x8xf32>, vector<2x8x8xf32> -> vector<2x8x32xf32>
    %219 = vector.shape_cast %218 : vector<2x8x32xf32> to vector<16x32xf32>
    %220 = arith.truncf %219 : vector<16x32xf32> to vector<16x32xbf16>
    %c1_72 = arith.constant 1 : index
    %c3_73 = arith.constant 3 : index
    %c0_74 = arith.constant 0 : index
    %c0_75 = arith.constant 0 : index
    %221 = vector.load %arg3[%c1_72, %c3_73, %c0_74, %c0_75] : memref<2x4x32x32xbf16, #tpu.memory_space<vmem>>, vector<1x1x32x32xbf16>
    %222 = vector.shape_cast %221 : vector<1x1x32x32xbf16> to vector<32x32xbf16>
    %cst_76 = arith.constant dense<0.000000e+00> : vector<16x32xf32>
    %223 = tpu.matmul %220, %222, %cst_76 {dimension_numbers = #tpu.dot_dimension_numbers<[1], [0], [0], [1], [0, 0, 1, 1], [], []>} : vector<16x32xbf16>, vector<32x32xbf16>, vector<16x32xf32> -> vector<16x32xf32>
    %224 = vector.broadcast %155 : vector<1x32xf32> to vector<16x32xf32>
    %225 = arith.addf %223, %224 : vector<16x32xf32>
    %226 = arith.addf %149, %225 : vector<16x32xf32>
    %cst_77 = arith.constant dense<0.000000e+00> : vector<16xf32>
    %227 = vector.multi_reduction <add>, %226, %cst_77 [1] : vector<16x32xf32> to vector<16xf32>
    %228 = vector.shape_cast %227 : vector<16xf32> to vector<16x1xf32>
    %cst_78 = arith.constant 3.200000e+01 : f32
    %229 = vector.broadcast %cst_78 : f32 to vector<16x1xf32>
    %230 = arith.divf %228, %229 : vector<16x1xf32>
    %231 = vector.broadcast %230 : vector<16x1xf32> to vector<16x32xf32>
    %232 = arith.subf %226, %231 : vector<16x32xf32>
    %233 = arith.mulf %232, %232 : vector<16x32xf32>
    %cst_79 = arith.constant dense<0.000000e+00> : vector<16xf32>
    %234 = vector.multi_reduction <add>, %233, %cst_79 [1] : vector<16x32xf32> to vector<16xf32>
    %235 = vector.shape_cast %234 : vector<16xf32> to vector<16x1xf32>
    %cst_80 = arith.constant 3.200000e+01 : f32
    %236 = vector.broadcast %cst_80 : f32 to vector<16x1xf32>
    %237 = arith.divf %235, %236 : vector<16x1xf32>
    %238 = vector.broadcast %230 : vector<16x1xf32> to vector<16x32xf32>
    %239 = arith.subf %226, %238 : vector<16x32xf32>
    %cst_81 = arith.constant 9.99999997E-7 : f32
    %240 = vector.broadcast %cst_81 : f32 to vector<16x1xf32>
    %241 = arith.addf %237, %240 : vector<16x1xf32>
    %242 = math.rsqrt %241 : vector<16x1xf32>
    %243 = vector.broadcast %242 : vector<16x1xf32> to vector<16x32xf32>
    %244 = arith.mulf %239, %243 : vector<16x32xf32>
    %245 = vector.broadcast %156 : vector<1x32xf32> to vector<16x32xf32>
    %246 = arith.mulf %244, %245 : vector<16x32xf32>
    %247 = vector.broadcast %157 : vector<1x32xf32> to vector<16x32xf32>
    %248 = arith.addf %246, %247 : vector<16x32xf32>
    %c1_82 = arith.constant 1 : index
    %c0_83 = arith.constant 0 : index
    %c0_84 = arith.constant 0 : index
    %249 = vector.load %arg4[%c1_82, %c0_83, %c0_84] : memref<2x96x64xbf16, #tpu.memory_space<vmem>>, vector<1x32x64xbf16>
    %250 = vector.shape_cast %249 : vector<1x32x64xbf16> to vector<32x64xbf16>
    %c1_85 = arith.constant 1 : index
    %c32_86 = arith.constant 32 : index
    %c0_87 = arith.constant 0 : index
    %251 = vector.load %arg4[%c1_85, %c32_86, %c0_87] : memref<2x96x64xbf16, #tpu.memory_space<vmem>>, vector<1x64x32xbf16>
    %252 = vector.shape_cast %251 : vector<1x64x32xbf16> to vector<64x32xbf16>
    %253 = arith.truncf %248 : vector<16x32xf32> to vector<16x32xbf16>
    %cst_88 = arith.constant dense<0.000000e+00> : vector<16x64xf32>
    %254 = tpu.matmul %253, %250, %cst_88 {dimension_numbers = #tpu.dot_dimension_numbers<[1], [0], [0], [1], [0, 0, 1, 1], [], []>} : vector<16x32xbf16>, vector<32x64xbf16>, vector<16x64xf32> -> vector<16x64xf32>
    %255 = vector.broadcast %158 : vector<1x64xf32> to vector<16x64xf32>
    %256 = arith.addf %254, %255 : vector<16x64xf32>
    %cst_89 = arith.constant 0.000000e+00 : f32
    %257 = vector.broadcast %cst_89 : f32 to vector<16x64xf32>
    %258 = arith.maximumf %256, %257 : vector<16x64xf32>
    %259 = arith.truncf %258 : vector<16x64xf32> to vector<16x64xbf16>
    %cst_90 = arith.constant dense<0.000000e+00> : vector<16x32xf32>
    %260 = tpu.matmul %259, %252, %cst_90 {dimension_numbers = #tpu.dot_dimension_numbers<[1], [0], [0], [1], [0, 0, 1, 1], [], []>} : vector<16x64xbf16>, vector<64x32xbf16>, vector<16x32xf32> -> vector<16x32xf32>
    %261 = vector.broadcast %159 : vector<1x32xf32> to vector<16x32xf32>
    %262 = arith.addf %260, %261 : vector<16x32xf32>
    %263 = arith.addf %248, %262 : vector<16x32xf32>
    %cst_91 = arith.constant dense<0.000000e+00> : vector<16xf32>
    %264 = vector.multi_reduction <add>, %263, %cst_91 [1] : vector<16x32xf32> to vector<16xf32>
    %265 = vector.shape_cast %264 : vector<16xf32> to vector<16x1xf32>
    %cst_92 = arith.constant 3.200000e+01 : f32
    %266 = vector.broadcast %cst_92 : f32 to vector<16x1xf32>
    %267 = arith.divf %265, %266 : vector<16x1xf32>
    %268 = vector.broadcast %267 : vector<16x1xf32> to vector<16x32xf32>
    %269 = arith.subf %263, %268 : vector<16x32xf32>
    %270 = arith.mulf %269, %269 : vector<16x32xf32>
    %cst_93 = arith.constant dense<0.000000e+00> : vector<16xf32>
    %271 = vector.multi_reduction <add>, %270, %cst_93 [1] : vector<16x32xf32> to vector<16xf32>
    %272 = vector.shape_cast %271 : vector<16xf32> to vector<16x1xf32>
    %cst_94 = arith.constant 3.200000e+01 : f32
    %273 = vector.broadcast %cst_94 : f32 to vector<16x1xf32>
    %274 = arith.divf %272, %273 : vector<16x1xf32>
    %275 = vector.broadcast %267 : vector<16x1xf32> to vector<16x32xf32>
    %276 = arith.subf %263, %275 : vector<16x32xf32>
    %cst_95 = arith.constant 9.99999997E-7 : f32
    %277 = vector.broadcast %cst_95 : f32 to vector<16x1xf32>
    %278 = arith.addf %274, %277 : vector<16x1xf32>
    %279 = math.rsqrt %278 : vector<16x1xf32>
    %280 = vector.broadcast %279 : vector<16x1xf32> to vector<16x32xf32>
    %281 = arith.mulf %276, %280 : vector<16x32xf32>
    %282 = vector.broadcast %160 : vector<1x32xf32> to vector<16x32xf32>
    %283 = arith.mulf %281, %282 : vector<16x32xf32>
    %284 = vector.broadcast %161 : vector<1x32xf32> to vector<16x32xf32>
    %285 = arith.addf %283, %284 : vector<16x32xf32>
    %286 = vector.shape_cast %285 : vector<16x32xf32> to vector<2x8x32xf32>
    %cst_96 = arith.constant dense<0.000000e+00> : vector<2x32xf32>
    %287 = vector.multi_reduction <add>, %286, %cst_96 [1] : vector<2x8x32xf32> to vector<2x32xf32>
    %cst_97 = arith.constant 8.000000e+00 : f32
    %288 = vector.broadcast %cst_97 : f32 to vector<2x32xf32>
    %289 = arith.divf %287, %288 : vector<2x32xf32>
    %c2_98 = arith.constant 2 : index
    %c0_99 = arith.constant 0 : index
    %c0_100 = arith.constant 0 : index
    %290 = vector.load %arg6[%c2_98, %c0_99, %c0_100] : memref<3x16x128xf32, #tpu.memory_space<vmem>>, vector<1x16x128xf32>
    %291 = vector.shape_cast %290 : vector<1x16x128xf32> to vector<16x128xf32>
    %292 = vector.extract_strided_slice %291 {offsets = [0, 0], sizes = [1, 20], strides = [1, 1]} : vector<16x128xf32> to vector<1x20xf32>
    %293 = vector.extract_strided_slice %291 {offsets = [1, 0], sizes = [1, 2], strides = [1, 1]} : vector<16x128xf32> to vector<1x2xf32>
    %c0_101 = arith.constant 0 : index
    %c0_102 = arith.constant 0 : index
    %294 = vector.load %arg5[%c0_101, %c0_102] : memref<52x20xbf16, #tpu.memory_space<vmem>>, vector<32x20xbf16>
    %c32_103 = arith.constant 32 : index
    %c0_104 = arith.constant 0 : index
    %295 = vector.load %arg5[%c32_103, %c0_104] : memref<52x20xbf16, #tpu.memory_space<vmem>>, vector<20x2xbf16>
    %296 = arith.truncf %289 : vector<2x32xf32> to vector<2x32xbf16>
    %cst_105 = arith.constant dense<0.000000e+00> : vector<2x20xf32>
    %297 = tpu.matmul %296, %294, %cst_105 {dimension_numbers = #tpu.dot_dimension_numbers<[1], [0], [0], [1], [0, 0, 1, 1], [], []>} : vector<2x32xbf16>, vector<32x20xbf16>, vector<2x20xf32> -> vector<2x20xf32>
    %298 = vector.broadcast %292 : vector<1x20xf32> to vector<2x20xf32>
    %299 = arith.addf %297, %298 : vector<2x20xf32>
    %300 = arith.truncf %299 : vector<2x20xf32> to vector<2x20xbf16>
    %cst_106 = arith.constant dense<0.000000e+00> : vector<2x2xf32>
    %301 = tpu.matmul %300, %295, %cst_106 {dimension_numbers = #tpu.dot_dimension_numbers<[1], [0], [0], [1], [0, 0, 1, 1], [], []>} : vector<2x20xbf16>, vector<20x2xbf16>, vector<2x2xf32> -> vector<2x2xf32>
    %302 = vector.broadcast %293 : vector<1x2xf32> to vector<2x2xf32>
    %303 = arith.addf %301, %302 : vector<2x2xf32>
    %c0_107 = arith.constant 0 : index
    %c0_108 = arith.constant 0 : index
    %304 = vector.load %arg7[%c0_107, %c0_108] : memref<2x2xf32, #tpu.memory_space<vmem>>, vector<2x2xf32>
    tpu.vector_store %arg7[%c0_107, %c0_108], %303 {strides = array<i32>} : memref<2x2xf32, #tpu.memory_space<vmem>>, vector<2x2xf32>,
    return
  }
  func.func @transform_0(%arg0: i32) -> (i32, i32) {
    %c0_i32 = arith.constant 0 : i32
    %c0_i32_0 = arith.constant 0 : i32
    %c0_i32_1 = arith.constant 0 : i32
    return %c0_i32, %c0_i32_0 : i32, i32
  }
  func.func @transform_1(%arg0: i32) -> (i32, i32) {
    %c0_i32 = arith.constant 0 : i32
    %c0_i32_0 = arith.constant 0 : i32
    %c0_i32_1 = arith.constant 0 : i32
    return %c0_i32, %c0_i32_0 : i32, i32
  }
  func.func @transform_2(%arg0: i32) -> (i32, i32, i32, i32) {
    %c0_i32 = arith.constant 0 : i32
    %c0_i32_0 = arith.constant 0 : i32
    %c0_i32_1 = arith.constant 0 : i32
    %c0_i32_2 = arith.constant 0 : i32
    %c0_i32_3 = arith.constant 0 : i32
    return %c0_i32, %c0_i32_0, %c0_i32_1, %c0_i32_2 : i32, i32, i32, i32
  }
  func.func @transform_3(%arg0: i32) -> (i32, i32, i32) {
    %c0_i32 = arith.constant 0 : i32
    %c0_i32_0 = arith.constant 0 : i32
    %c0_i32_1 = arith.constant 0 : i32
    %c0_i32_2 = arith.constant 0 : i32
    return %c0_i32, %c0_i32_0, %c0_i32_1 : i32, i32, i32
  }
  func.func @transform_4(%arg0: i32) -> (i32, i32) {
    %c0_i32 = arith.constant 0 : i32
    %c0_i32_0 = arith.constant 0 : i32
    %c0_i32_1 = arith.constant 0 : i32
    return %c0_i32, %c0_i32_0 : i32, i32
  }
  func.func @transform_5(%arg0: i32) -> (i32, i32, i32) {
    %c0_i32 = arith.constant 0 : i32
    %c0_i32_0 = arith.constant 0 : i32
    %c0_i32_1 = arith.constant 0 : i32
    %c0_i32_2 = arith.constant 0 : i32
    return %c0_i32, %c0_i32_0, %c0_i32_1 : i32, i32, i32
  }
  func.func @transform_6(%arg0: i32) -> (i32, i32) {
    %c0_i32 = arith.constant 0 : i32
    %c0_i32_0 = arith.constant 0 : i32
    %c0_i32_1 = arith.constant 0 : i32
    return %c0_i32, %c0_i32_0 : i32, i32
  }
}

</mosaic_0001>

<bundles_post_ra>
// kernel: transformer_encoder_cls.1
= control target key start
LH: loop header
LB: loop body
LE: loop exit
PB: predicated region body
PF: predicated region fallthrough
CT: control target
= control target key end

     0   :  { %v4063_v2 = vmov 0   ;;  %v4064_v3 = vmov 0.0   ;;  %vm105_vm0 = vcmask 1043456   ;;  %vm4065_vm1 = vmmov 0   ;;  %s4751_s0 = inlined_call_operand.vmem [shape: s32[16,1], index: 0, kind: input, shape index: {}]   ;;  %s4752_s1 = inlined_call_operand.vmem [shape: bf16[120,32], index: 1, kind: input, shape index: {}]   ;;  %s4753_s2 = inlined_call_operand.vmem [shape: bf16[2,4,32,32], index: 2, kind: input, shape index: {}]   ;;  %s4754_s3 = inlined_call_operand.vmem [shape: bf16[2,96,64], index: 3, kind: input, shape index: {}]   ;;  %s4755_s4 = inlined_call_operand.vmem [shape: bf16[52,20], index: 4, kind: input, shape index: {}]   ;;  %s4756_s5 = inlined_call_operand.vmem [shape: f32[3,16,128], index: 5, kind: input, shape index: {}]   ;;  %s4757_s6 = inlined_call_operand.hbm [shape: f32[2,2], index: 6, kind: output, shape index: {}]  }
   0x1   :  { %v25_v0 = vld [vmem:[%s4751_s0] sm:$0xff]  ;;  %v4114_v1 = vld [vmem:[%s4752_s1 + $0x38] sm:$0xf]  ;;  %3800 = vset.pattern.permute.xlu0 %v4063_v2  ;;  %3458 = vmatprep.subr.bf16.mxu0 %v4064_v3  ;;  %v26_v5 = vld [vmem:[%s4751_s0 + $0x8] sm:$0xff] }
   0x2   :  { %v3216_v4 = vcombine.low %v4114_v1, %v4114_v1  ;;  %30 = vperm.xlu0 %3800, %v25_v0   ;;  %3478 = vmatprep.subr.bf16.mxu1 %v4064_v3  ;;  %v3922_v7 = vld [vmem:[%s4752_s1 + $0x30] sm:$0xff]   ;;  %v3923_v8 = vld [vmem:[%s4752_s1 + $0x28] sm:$0xff]   ;;  %v3924_v9 = vld [vmem:[%s4752_s1 + $0x20] sm:$0xff]  }
   0x3   :  { %3474 = vmatprep.mubr.msk.bf16.mxu0 %vm4065_vm1, %v4064_v3  ;;  %3482 = vmatprep.mubr.msk.bf16.mxu1 %vm4065_vm1, %v4064_v3  ;;  %v3925_v10 = vld [vmem:[%s4752_s1 + $0x18] sm:$0xff]   ;;  %v3926_v11 = vld [vmem:[%s4752_s1 + $0x10] sm:$0xff]   ;;  %v3927_v12 = vld [vmem:[%s4752_s1 + $0x8] sm:$0xff]  }
   0x4   :  { %v107_v6 = vsel %vm105_vm0, %v3216_v4, 0  ;;  %v3928_v13 = vld [vmem:[%s4752_s1] sm:$0xff]  }
   0x5   :  { %3459 = vmatpush3.bf16.msra.mxu0 %v107_v6 }
   0x6   :  { %3460 = vmatprep.subr.bf16.mxu0 %v4064_v3  ;;  %33 = vperm.xlu0 %3800, %v26_v5  }
   0x9   :  { %3461 = vmatpush3.bf16.msra.mxu0 %v3922_v7 }
   0xa   :  { %3462 = vmatprep.subr.bf16.mxu0 %v4064_v3 }
   0xd   :  { %3463 = vmatpush3.bf16.msra.mxu0 %v3923_v8 }
   0xe   :  { %3464 = vmatprep.subr.bf16.mxu0 %v4064_v3 }
  0x11   :  { %3465 = vmatpush3.bf16.msra.mxu0 %v3924_v9 }
  0x12   :  { %3466 = vmatprep.subr.bf16.mxu0 %v4064_v3 }
  0x15   :  { %3467 = vmatpush3.bf16.msra.mxu0 %v3925_v10 }
  0x16   :  { %3468 = vmatprep.subr.bf16.mxu0 %v4064_v3 }
  0x19   :  { %3469 = vmatpush3.bf16.msra.mxu0 %v3926_v11 }
  0x1a   :  { %3470 = vmatprep.subr.bf16.mxu0 %v4064_v3 }
  0x1d   :  { %3471 = vmatpush3.bf16.msra.mxu0 %v3927_v12 }
  0x1e   :  { %3472 = vmatprep.subr.bf16.mxu0 %v4064_v3 }
  0x1f   :  { %11 = vsyncpa [#allocation3], 0  ;;  %v27_v14 = vlaneseq  ;;  %vm101_vm4 = vcmask 982016   ;;  %v3929_v21 = vld [vmem:[%s4753_s2 + $0x8] sm:$0xff]   ;;  %v3930_v22 = vld [vmem:[%s4753_s2] sm:$0xff]   ;;  %v55_v24 = vunpack.c.l.bf16 %v4114_v1  ;;  %vm173_vm5 = vcmask 261120  }
  0x20   :  { %3479 = vmatpush3.bf16.msra.mxu1 %v3929_v21  ;;  %v3931_v30 = vld [vmem:[%s4753_s2 + $0x18] sm:$0xff]   ;;  %v3932_v32 = vld [vmem:[%s4753_s2 + $0x10] sm:$0xff]   ;;  %v3933_v33 = vld [vmem:[%s4753_s2 + $0x28] sm:$0xff]   ;;  %vm426_vm6 = vcmask 64512   ;;  %s4066_s29 = smov 112   ;;  %s4067_s30 = smov 120  }
  0x21   :  { %3473 = vmatpush3.bf16.msra.mxu0 %v3928_v13  ;;  %v28_v15 = vand.u32 127, %v27_v14  ;;  %3480 = vmatprep.subr.bf16.mxu1 %v4064_v3  ;;  %v3934_v34 = vld [vmem:[%s4753_s2 + $0x20] sm:$0xff]   ;;  %v4201_v35 = vshrl.u32 %v27_v14, 7  ;;  %s4068_s0 = smov 104   ;;  %s4069_s9 = smov 8   ;;  %vm1293_vm7 = vcmask 130048  }
  0x22   :  { %3508 = vmatprep.subr.bf16.mxu0 %v4064_v3  ;;  %v4209_v39 = vld [vmem:[%s4756_s5] sm:$0xff]  ;;  %s4070_s12 = smov 16   ;;  %s4071_s13 = smov 24   ;;  %vm1296_vm8 = vcmask 195584   ;;  %vm1510_vm9 = vcmask 523264   ;;  %vm3073_vm10 = vcmask 1041409  }
  0x23   :  { %v4204_v37 = vsub.s32 1, %v4201_v35  ;;  %v4214_v43 = vsub.s32 0, %v4201_v35  ;;  %v287_v52 = vsub.s32 2, %v4201_v35  ;;  %vm3149_vm11 = vcmask 1041408  }
  0x24   :  { %3481 = vmatpush3.bf16.msra.mxu1 %v3930_v22  ;;  %vm3145_vm12 = vcmask 162816   ;;  %vm3193_vm13 = vcmask 9216  }
  0x25   :  { %3486 = vmatprep.subr.bf16.mxu1 %v4064_v3  ;;  %v226_v41 = vrot.slane %v4209_v39, %v4204_v37  ;;  %v160_v47 = vrot.slane %v4209_v39, %v4214_v43  ;;  %v288_v59 = vrot.slane %v4209_v39, %v287_v52 }
  0x7d   :  { %v31_v16 = vpop.permute.xlu0 %30 }
  0x7e   :  { %vm35_vm2 = vcmp.eq.s32.totalorder %v28_v15, %v31_v16 }
  0x7f   :  { %v37_v18 = vsel %vm35_vm2, 1.0, %v4064_v3 }
  0x81   :  { %v34_v17 = vpop.permute.xlu0 %33 }
  0x82   :  { %vm36_vm3 = vcmp.eq.s32.totalorder %v28_v15, %v34_v17 }
  0x83   :  { %v38_v19 = vsel %vm36_vm3, 1.0, %v4064_v3 }
  0x84   :  { %v39_v20 = vpack.c.bf16 %v38_v19, %v37_v18 }
  0x86   :  { %3475 = vmatmul.mubr.msk.bf16.vlgmr.msra.gmra.mxu0 %vm101_vm4, %v39_v20 }
  0x87   :  { %3510 = vmatprep.mubr.msk.bf16.mxu0 %vm4065_vm1, %v4064_v3 }
 0x146   :  { %v143_v23 = vpop.f32.mrf.mxu0 }
 0x147   :  { %v4170_v27 = vadd.f32 %v143_v23, %v55_v24 }
 0x148   :  { %v3476_v25 = vpop.f32.mrf.mxu0 }
 0x14a   :  { %v146_v26 = vpop.f32.mrf.mxu0 }
 0x14b   :  { %v4172_v28 = vadd.f32 %v146_v26, %v55_v24 }
 0x14c   :  { %v3477_v29 = vpop.f32.mrf.mxu0 }
 0x14d   :  { %v152_v31 = vpack.c.bf16 %v4172_v28, %v4170_v27 }
 0x14f   :  { %3483 = vmatmul.mubr.msk.bf16.vlgmr.msra.gmra.mxu1 %vm173_vm5, %v152_v31 }
 0x150   :  { %3487 = vmatpush3.bf16.msra.mxu1 %v3931_v30  ;;  %3490 = vmatprep.mubr.msk.bf16.mxu1 %vm4065_vm1, %v4064_v3 }
 0x151   :  { %3488 = vmatprep.subr.bf16.mxu1 %v4064_v3 }
 0x154   :  { %3489 = vmatpush3.bf16.msra.mxu1 %v3932_v32 }
 0x155   :  { %3494 = vmatprep.subr.bf16.mxu1 %v4064_v3 }
 0x157   :  { %3491 = vmatmul.mubr.msk.bf16.vlgmr.msra.gmra.mxu1 %vm173_vm5, %v152_v31 }
 0x158   :  { %3495 = vmatpush3.bf16.msra.mxu1 %v3933_v33  ;;  %3498 = vmatprep.mubr.msk.bf16.mxu1 %vm4065_vm1, %v4064_v3 }
 0x159   :  { %3496 = vmatprep.subr.bf16.mxu1 %v4064_v3 }
 0x15c   :  { %3497 = vmatpush3.bf16.msra.mxu1 %v3934_v34 }
 0x15d   :  { %3502 = vmatprep.subr.bf16.mxu1 %v4064_v3 }
 0x15f   :  { %3499 = vmatmul.mubr.msk.bf16.vlgmr.msra.gmra.mxu1 %vm173_vm5, %v152_v31 }
 0x160   :  { %3504 = vmatprep.mubr.msk.bf16.mxu1 %vm4065_vm1, %v4064_v3 }
 0x20f   :  { %v211_v36 = vpop.f32.mrf.mxu1 }
 0x210   :  { %v212_v54 = vadd.f32 %v211_v36, %v160_v47 }
 0x211   :  { %v3484_v38 = vpop.f32.mrf.mxu1 }
 0x212   :  { %v362_v62 = vpack.c.bf16 %v212_v54, %v212_v54 }
 0x213   :  { %v214_v40 = vpop.f32.mrf.mxu1 }
 0x214   :  { %v215_v57 = vadd.f32 %v214_v40, %v160_v47 }
 0x215   :  { %v3485_v42 = vpop.f32.mrf.mxu1 }
 0x216   :  { %v3806_v0 = vpack.i.bf16 %v215_v57, %v212_v54  ;;  %v363_v5 = vpack.c.bf16 %v215_v57, %v215_v57 }
 0x217   :  { %v273_v44 = vpop.f32.mrf.mxu1 }
 0x218   :  { %v274_v45 = vadd.f32 %v273_v44, %v226_v41 }
 0x219   :  { %v3492_v46 = vpop.f32.mrf.mxu1 }
 0x21a   :  { %v390_v48 = vpack.c.bf16 %v274_v45, %v274_v45 }
 0x21b   :  { %v276_v49 = vpop.f32.mrf.mxu1 }
 0x21c   :  { %v277_v50 = vadd.f32 %v276_v49, %v226_v41  ;;  %v431_v51 = vsel %vm426_vm6, %v390_v48, 0 }
 0x21d   :  { %v3493_v53 = vpop.f32.mrf.mxu1  ;;  %3503 = vmatpush3.bf16.xpose.msra.mxu1 %v431_v51 }
 0x21e   :  { %v3811_v55 = vpack.i.bf16 %v277_v50, %v274_v45  ;;  %v391_v56 = vpack.c.bf16 %v277_v50, %v277_v50  ;;  %3514 = vmatprep.subr.bf16.mxu1 %v4064_v3 }
 0x21f   :  { %v335_v58 = vpop.f32.mrf.mxu1 }
 0x220   :  { %3812 = vrot.lane.b32.xlu0 %v3811_v55, %s4066_s29  ;;  %3802 = vrot.lane.b32.xlu1 %v3811_v55, %s4067_s30  ;;  %v477_v60 = vsel %vm426_vm6, %v391_v56, 0  ;;  %v4228_v1 = vadd.f32 %v335_v58, %v288_v59 }
 0x221   :  { %v3500_v61 = vpop.f32.mrf.mxu1  ;;  %3509 = vmatpush3.bf16.xpose.msra.mxu0 %v477_v60 }
 0x222   :  { %3520 = vmatprep.subr.bf16.mxu0 %v4064_v3  ;;  %v418_v47 = vpack.c.bf16 %v4228_v1, %v4228_v1 }
 0x223   :  { %v338_v63 = vpop.f32.mrf.mxu1 }
 0x224   :  { %v4230_v2 = vadd.f32 %v338_v63, %v288_v59  ;;  %3505 = vmatmul.mubr.msk.bf16.vlgmr.msra.gmra.mxu1 %vm426_vm6, %v362_v62  ;;  %3822 = vrot.lane.b32.xlu0 %v3811_v55, %s4068_s0  ;;  %v903_v51 = vsel %vm105_vm0, %v418_v47, 0 }
 0x225   :  { %3807 = vrot.lane.b32.xlu1 %v3806_v0, %s4067_s30  ;;  %v3501_v4 = vpop.f32.mrf.mxu1  ;;  %3516 = vmatprep.mubr.msk.bf16.mxu1 %vm4065_vm1, %v4064_v3 }
 0x226   :  { %v4239_v6 = vpack.i.bf16 %v4230_v2, %v4228_v1  ;;  %v419_v48 = vpack.c.bf16 %v4230_v2, %v4230_v2 }
 0x228   :  { %3511 = vmatmul.mubr.msk.bf16.vlgmr.msra.gmra.mxu0 %vm426_vm6, %v363_v5  ;;  %v949_v53 = vsel %vm105_vm0, %v419_v48, 0 }
 0x229   :  { %3817 = vrot.lane.b32.xlu1 %v3806_v0, %s4066_s29  ;;  %3522 = vmatprep.mubr.msk.bf16.mxu0 %vm4065_vm1, %v4064_v3 }
 0x22d   :  { %3827 = vrot.lane.b32.xlu1 %v3806_v0, %s4068_s0 }
 0x292   :  { %v3803_v7 = vpop.permute.xlu1 %3802  ;;  %v3813_v10 = vpop.permute.xlu0 %3812 }
 0x293   :  { %v3805_v8 = vunpack.i.h.bf16 %v3803_v7  ;;  %v3804_v9 = vunpack.i.l.bf16 %v3803_v7  ;;  %v3815_v13 = vunpack.i.h.bf16 %v3813_v10  ;;  %v3814_v14 = vunpack.i.l.bf16 %v3813_v10 }
 0x295   :  { %v393_v11 = vpack.c.bf16 %v3805_v8, %v3805_v8  ;;  %v392_v12 = vpack.c.bf16 %v3804_v9, %v3804_v9  ;;  %v395_v20 = vpack.c.bf16 %v3815_v13, %v3815_v13  ;;  %v394_v21 = vpack.c.bf16 %v3814_v14, %v3814_v14 }
 0x296   :  { %v3823_v22 = vpop.permute.xlu0 %3822 }
 0x297   :  { %v3808_v15 = vpop.permute.xlu1 %3807  ;;  %v523_v16 = vsel %vm426_vm6, %v392_v12, 0  ;;  %v569_v17 = vsel %vm426_vm6, %v393_v11, 0  ;;  %v3825_v26 = vunpack.i.h.bf16 %v3823_v22  ;;  %v3824_v29 = vunpack.i.l.bf16 %v3823_v22 }
 0x298   :  { %3515 = vmatpush3.bf16.xpose.msra.mxu1 %v523_v16  ;;  %3521 = vmatpush3.bf16.xpose.msra.mxu0 %v569_v17  ;;  %v3810_v18 = vunpack.i.h.bf16 %v3808_v15  ;;  %v3809_v19 = vunpack.i.l.bf16 %v3808_v15  ;;  %v615_v30 = vsel %vm426_vm6, %v394_v21, 0  ;;  %v661_v31 = vsel %vm426_vm6, %v395_v20, 0 }
 0x299   :  { %3526 = vmatprep.subr.bf16.mxu1 %v4064_v3  ;;  %3532 = vmatprep.subr.bf16.mxu0 %v4064_v3  ;;  %v397_v34 = vpack.c.bf16 %v3825_v26, %v3825_v26  ;;  %v396_v36 = vpack.c.bf16 %v3824_v29, %v3824_v29 }
 0x29a   :  { %v365_v23 = vpack.c.bf16 %v3810_v18, %v3810_v18  ;;  %v364_v24 = vpack.c.bf16 %v3809_v19, %v3809_v19 }
 0x29b   :  { %v3818_v25 = vpop.permute.xlu1 %3817  ;;  %v707_v42 = vsel %vm426_vm6, %v396_v36, 0  ;;  %v753_v44 = vsel %vm426_vm6, %v397_v34, 0 }
 0x29c   :  { %v3820_v32 = vunpack.i.h.bf16 %v3818_v25  ;;  %v3819_v33 = vunpack.i.l.bf16 %v3818_v25 }
 0x29e   :  { %v367_v38 = vpack.c.bf16 %v3820_v32, %v3820_v32  ;;  %v366_v40 = vpack.c.bf16 %v3819_v33, %v3819_v33 }
 0x29f   :  { %3517 = vmatmul.mubr.msk.bf16.vlgmr.msra.gmra.mxu1 %vm426_vm6, %v364_v24  ;;  %3523 = vmatmul.mubr.msk.bf16.vlgmr.msra.gmra.mxu0 %vm426_vm6, %v365_v23  ;;  %v3828_v41 = vpop.permute.xlu1 %3827 }
 0x2a0   :  { %3527 = vmatpush3.bf16.xpose.msra.mxu1 %v615_v30  ;;  %3533 = vmatpush3.bf16.xpose.msra.mxu0 %v661_v31  ;;  %v3830_v45 = vunpack.i.h.bf16 %v3828_v41  ;;  %v3829_v46 = vunpack.i.l.bf16 %v3828_v41 }
 0x2a1   :  { %3528 = vmatprep.mubr.msk.bf16.mxu1 %vm4065_vm1, %v4064_v3  ;;  %3534 = vmatprep.mubr.msk.bf16.mxu0 %vm4065_vm1, %v4064_v3 }
 0x2a2   :  { %3538 = vmatprep.subr.bf16.mxu1 %v4064_v3  ;;  %3544 = vmatprep.subr.bf16.mxu0 %v4064_v3  ;;  %v369_v49 = vpack.c.bf16 %v3830_v45, %v3830_v45  ;;  %v368_v50 = vpack.c.bf16 %v3829_v46, %v3829_v46 }
 0x2a7   :  { %3529 = vmatmul.mubr.msk.bf16.vlgmr.msra.gmra.mxu1 %vm426_vm6, %v366_v40  ;;  %3535 = vmatmul.mubr.msk.bf16.vlgmr.msra.gmra.mxu0 %vm426_vm6, %v367_v38 }
 0x2a8   :  { %3539 = vmatpush3.bf16.xpose.msra.mxu1 %v707_v42  ;;  %3545 = vmatpush3.bf16.xpose.msra.mxu0 %v753_v44 }
 0x2a9   :  { %3540 = vmatprep.mubr.msk.bf16.mxu1 %vm4065_vm1, %v4064_v3  ;;  %3546 = vmatprep.mubr.msk.bf16.mxu0 %vm4065_vm1, %v4064_v3 }
 0x2aa   :  { %3550 = vmatprep.subr.bf16.mxu1 %v4064_v3  ;;  %3556 = vmatprep.subr.bf16.mxu0 %v4064_v3 }
 0x2af   :  { %3541 = vmatmul.mubr.msk.bf16.vlgmr.msra.gmra.mxu1 %vm426_vm6, %v368_v50  ;;  %3547 = vmatmul.mubr.msk.bf16.vlgmr.msra.gmra.mxu0 %vm426_vm6, %v369_v49 }
 0x2b0   :  { %3551 = vmatpush3.bf16.msra.mxu1 %v903_v51  ;;  %3557 = vmatpush3.bf16.msra.mxu0 %v949_v53 }
 0x2b1   :  { %3558 = vmatprep.mubr.msk.bf16.mxu0 %vm4065_vm1, %v4064_v3  ;;  %3568 = vmatprep.subr.bf16.mxu0 %v4064_v3 }
 0x2b2   :  { %3552 = vmatprep.mubr.msk.bf16.mxu1 %vm4065_vm1, %v4064_v3  ;;  %3562 = vmatprep.subr.bf16.mxu1 %v4064_v3 }
 0x2e4   :  { %v467_v54 = vpop.f32.mrf.mxu1 }
 0x2e5   :  { %v4284_v55 = vmul.f32 0.35355338, %v467_v54 }
 0x2e6   :  { %v3506_v56 = vpop.f32.mrf.mxu1 }
 0x2e7   :  { %v803_v57 = vsel %vm426_vm6, %v4284_v55, -inf }
 0x2e8   :  { %804 = vmax.xlane.f32.xlu0 %v803_v57  ;;  %v470_v58 = vpop.f32.mrf.mxu1  ;;  %v513_v59 = vpop.f32.mrf.mxu0 }
 0x2e9   :  { %v796_v60 = vmul.f32 0.35355338, %v513_v59 }
 0x2ea   :  { %v3507_v61 = vpop.f32.mrf.mxu1  ;;  %v3512_v62 = vpop.f32.mrf.mxu0 }
 0x2eb   :  { %v806_v63 = vsel %vm426_vm6, %v796_v60, -inf }
 0x2ec   :  { %807 = vmax.xlane.f32.xlu1 %v806_v63  ;;  %v516_v0 = vpop.f32.mrf.mxu0 }
 0x2ee   :  { %v3513_v1 = vpop.f32.mrf.mxu0 }
 0x35f   :  { %v559_v2 = vpop.f32.mrf.mxu1  ;;  %v605_v4 = vpop.f32.mrf.mxu0 }
 0x360   :  { %v797_v5 = vmul.f32 0.35355338, %v559_v2  ;;  %v798_v9 = vmul.f32 0.35355338, %v605_v4 }
 0x361   :  { %v3518_v7 = vpop.f32.mrf.mxu1  ;;  %v3524_v8 = vpop.f32.mrf.mxu0 }
 0x362   :  { %v809_v10 = vsel %vm426_vm6, %v797_v5, -inf  ;;  %v812_v15 = vsel %vm426_vm6, %v798_v9, -inf }
 0x363   :  { %810 = vmax.xlane.f32.xlu0 %v809_v10  ;;  %v562_v11 = vpop.f32.mrf.mxu1  ;;  %v608_v12 = vpop.f32.mrf.mxu0 }
 0x365   :  { %v3519_v13 = vpop.f32.mrf.mxu1  ;;  %v3525_v14 = vpop.f32.mrf.mxu0 }
 0x367   :  { %v651_v16 = vpop.f32.mrf.mxu1  ;;  %813 = vmax.xlane.f32.xlu0 %v812_v15  ;;  %v697_v17 = vpop.f32.mrf.mxu0 }
 0x368   :  { %v799_v18 = vmul.f32 0.35355338, %v651_v16  ;;  %v800_v19 = vmul.f32 0.35355338, %v697_v17 }
 0x369   :  { %v3530_v20 = vpop.f32.mrf.mxu1  ;;  %v3536_v21 = vpop.f32.mrf.mxu0 }
 0x36a   :  { %v815_v22 = vsel %vm426_vm6, %v799_v18, -inf  ;;  %v818_v23 = vsel %vm426_vm6, %v800_v19, -inf }
 0x36b   :  { %v654_v24 = vpop.f32.mrf.mxu1  ;;  %816 = vmax.xlane.f32.xlu1 %v815_v22  ;;  %819 = vmax.xlane.f32.xlu0 %v818_v23  ;;  %v700_v25 = vpop.f32.mrf.mxu0 }
 0x36d   :  { %v3531_v26 = vpop.f32.mrf.mxu1  ;;  %v3537_v29 = vpop.f32.mrf.mxu0 }
 0x36f   :  { %v743_v30 = vpop.f32.mrf.mxu1  ;;  %v789_v31 = vpop.f32.mrf.mxu0 }
 0x370   :  { %v801_v32 = vmul.f32 0.35355338, %v743_v30  ;;  %v802_v33 = vmul.f32 0.35355338, %v789_v31 }
 0x371   :  { %v3542_v34 = vpop.f32.mrf.mxu1  ;;  %v3548_v36 = vpop.f32.mrf.mxu0 }
 0x372   :  { %v821_v38 = vsel %vm426_vm6, %v801_v32, -inf  ;;  %v824_v40 = vsel %vm426_vm6, %v802_v33, -inf  ;;  %v805_v51 = vpop.xlane.xlu0 %804 }
 0x373   :  { %v746_v41 = vpop.f32.mrf.mxu1  ;;  %822 = vmax.xlane.f32.xlu1 %v821_v38  ;;  %825 = vmax.xlane.f32.xlu0 %v824_v40  ;;  %v792_v42 = vpop.f32.mrf.mxu0  ;;  %v827_v53 = vsub.f32 %v4284_v55, %v805_v51 }
 0x375   :  { %v3543_v44 = vpop.f32.mrf.mxu1  ;;  %v808_v45 = vpop.xlane.xlu1 %807  ;;  %v835_v54 = vmul.f32 1.442695, %v827_v53 }
 0x376   :  { %v828_v46 = vsub.f32 %v796_v60, %v808_v45  ;;  %v3549_v47 = vpop.f32.mrf.mxu0 }
 0x378   :  { %v837_v48 = vmul.f32 1.442695, %v828_v46 }
 0x37a   :  { %3961 = vpow2.f32 %v837_v48 }
 0x37b   :  { %3963 = vpow2.f32 %v835_v54 }
 0x384   :  { %3832 = vrot.lane.b32.xlu1 %v4239_v6, %s4067_s30 }
 0x387   :  { %v3962_v49 = vpop.eup %3961 }
 0x388   :  { %v854_v50 = vsel %vm426_vm6, %v3962_v49, 0.0  ;;  %v4299_v56 = vpop.eup %3963 }
 0x389   :  { %855 = vadd.xlane.f32.xlu0 %v854_v50  ;;  %v851_v57 = vsel %vm426_vm6, %v4299_v56, 0.0 }
 0x3a8   :  { %852 = vadd.xlane.f32.xlu1 %v851_v57 }
 0x3ec   :  { %v811_v58 = vpop.xlane.xlu0 %810 }
 0x3ed   :  { %v829_v59 = vsub.f32 %v797_v5, %v811_v58 }
 0x3ef   :  { %v839_v60 = vmul.f32 1.442695, %v829_v59 }
 0x3f0   :  { %v814_v61 = vpop.xlane.xlu0 %813 }
 0x3f1   :  { %3965 = vpow2.f32 %v839_v60  ;;  %v830_v62 = vsub.f32 %v798_v9, %v814_v61 }
 0x3f3   :  { %v841_v63 = vmul.f32 1.442695, %v830_v62 }
 0x3f4   :  { %v817_v0 = vpop.xlane.xlu1 %816  ;;  %v820_v1 = vpop.xlane.xlu0 %819 }
 0x3f5   :  { %3967 = vpow2.f32 %v841_v63  ;;  %v831_v2 = vsub.f32 %v799_v18, %v817_v0  ;;  %v832_v55 = vsub.f32 %v800_v19, %v820_v1 }
 0x3f7   :  { %v843_v4 = vmul.f32 1.442695, %v831_v2  ;;  %v845_v7 = vmul.f32 1.442695, %v832_v55 }
 0x3f9   :  { %3969 = vpow2.f32 %v843_v4 }
 0x3fa   :  { %3971 = vpow2.f32 %v845_v7 }
 0x3fc   :  { %v823_v8 = vpop.xlane.xlu1 %822  ;;  %v826_v10 = vpop.xlane.xlu0 %825 }
 0x3fd   :  { %v833_v11 = vsub.f32 %v801_v32, %v823_v8  ;;  %v834_v12 = vsub.f32 %v802_v33, %v826_v10 }
 0x3fe   :  { %v3966_v13 = vpop.eup %3965 }
 0x3ff   :  { %v847_v5 = vmul.f32 1.442695, %v833_v11  ;;  %v849_v14 = vmul.f32 1.442695, %v834_v12  ;;  %v857_v15 = vsel %vm426_vm6, %v3966_v13, 0.0 }
 0x400   :  { %858 = vadd.xlane.f32.xlu1 %v857_v15  ;;  %v3833_v26 = vpop.permute.xlu1 %3832 }
 0x401   :  { %3973 = vpow2.f32 %v847_v5  ;;  %v3835_v29 = vunpack.i.h.bf16 %v3833_v26  ;;  %v3834_v38 = vunpack.i.l.bf16 %v3833_v26 }
 0x402   :  { %v3968_v9 = vpop.eup %3967  ;;  %3975 = vpow2.f32 %v849_v14 }
 0x403   :  { %v860_v16 = vsel %vm426_vm6, %v3968_v9, 0.0  ;;  %v421_v31 = vpack.c.bf16 %v3835_v29, %v3835_v29  ;;  %v420_v41 = vpack.c.bf16 %v3834_v38, %v3834_v38  ;;  %v3935_v38 = vld [vmem:[%s4753_s2 + $0x38] sm:$0xff]  }
 0x404   :  { %861 = vadd.xlane.f32.xlu0 %v860_v16 }
 0x405   :  { %v1041_v34 = vsel %vm105_vm0, %v421_v31, 0  ;;  %v995_v45 = vsel %vm105_vm0, %v420_v41, 0 }
 0x406   :  { %v4305_v17 = vpop.eup %3969 }
 0x407   :  { %v4307_v18 = vpop.eup %3971  ;;  %v863_v19 = vsel %vm426_vm6, %v4305_v17, 0.0 }
 0x408   :  { %864 = vadd.xlane.f32.xlu1 %v863_v19  ;;  %v866_v20 = vsel %vm426_vm6, %v4307_v18, 0.0 }
 0x409   :  { %867 = vadd.xlane.f32.xlu0 %v866_v20 }
 0x40e   :  { %v4313_v21 = vpop.eup %3973 }
 0x40f   :  { %v4315_v22 = vpop.eup %3975  ;;  %v869_v23 = vsel %vm426_vm6, %v4313_v21, 0.0 }
 0x410   :  { %870 = vadd.xlane.f32.xlu1 %v869_v23  ;;  %v872_v24 = vsel %vm426_vm6, %v4315_v22, 0.0 }
 0x411   :  { %873 = vadd.xlane.f32.xlu0 %v872_v24 }
 0x412   :  { %v856_v25 = vpop.xlane.xlu0 %855 }
 0x413   :  { %3977 = vrcp.f32 %v856_v25 }
 0x420   :  { %v3978_v30 = vpop.eup %3977 }
 0x421   :  { %3842 = vrot.lane.b32.xlu1 %v4239_v6, %s4068_s0  ;;  %v884_v32 = vmul.f32 %v3978_v30, %v3962_v49 }
 0x423   :  { %v892_v33 = vpack.c.bf16 %v884_v32, %v884_v32 }
 0x425   :  { %3559 = vmatmul.mubr.msk.bf16.vlgmr.msra.gmra.mxu0 %vm426_vm6, %v892_v33 }
 0x426   :  { %3569 = vmatpush3.bf16.msra.mxu0 %v1041_v34  ;;  %3570 = vmatprep.mubr.msk.bf16.mxu0 %vm4065_vm1, %v4064_v3 }
 0x427   :  { %3837 = vrot.lane.b32.xlu0 %v4239_v6, %s4066_s29  ;;  %3580 = vmatprep.subr.bf16.mxu0 %v4064_v3 }
 0x431   :  { %v853_v36 = vpop.xlane.xlu1 %852 }
 0x432   :  { %3979 = vrcp.f32 %v853_v36 }
 0x43f   :  { %v3980_v40 = vpop.eup %3979 }
 0x440   :  { %v883_v42 = vmul.f32 %v3980_v40, %v4299_v56 }
 0x442   :  { %v891_v44 = vpack.c.bf16 %v883_v42, %v883_v42 }
 0x444   :  { %3553 = vmatmul.mubr.msk.bf16.vlgmr.msra.gmra.mxu1 %vm426_vm6, %v891_v44 }
 0x445   :  { %3563 = vmatpush3.bf16.msra.mxu1 %v995_v45  ;;  %3564 = vmatprep.mubr.msk.bf16.mxu1 %vm4065_vm1, %v4064_v3 }
 0x446   :  { %3574 = vmatprep.subr.bf16.mxu1 %v4064_v3 }
 0x489   :  { %v859_v6 = vpop.xlane.xlu1 %858 }
 0x48a   :  { %3981 = vrcp.f32 %v859_v6 }
 0x48d   :  { %v862_v46 = vpop.xlane.xlu0 %861 }
 0x48e   :  { %3983 = vrcp.f32 %v862_v46  ;;  %v3936_v46 = vld [vmem:[%s4753_s2 + $0x30] sm:$0xff]  }
 0x491   :  { %v865_v47 = vpop.xlane.xlu1 %864 }
 0x492   :  { %3985 = vrcp.f32 %v865_v47  ;;  %v868_v48 = vpop.xlane.xlu0 %867 }
 0x493   :  { %3987 = vrcp.f32 %v868_v48 }
 0x497   :  { %v3982_v49 = vpop.eup %3981 }
 0x498   :  { %v885_v50 = vmul.f32 %v3982_v49, %v3966_v13 }
 0x499   :  { %v871_v51 = vpop.xlane.xlu1 %870 }
 0x49a   :  { %3989 = vrcp.f32 %v871_v51  ;;  %v874_v53 = vpop.xlane.xlu0 %873  ;;  %v893_v54 = vpack.c.bf16 %v885_v50, %v885_v50 }
 0x49b   :  { %v3984_v56 = vpop.eup %3983  ;;  %3991 = vrcp.f32 %v874_v53 }
 0x49c   :  { %3565 = vmatmul.mubr.msk.bf16.vlgmr.msra.gmra.mxu1 %vm426_vm6, %v893_v54  ;;  %v886_v57 = vmul.f32 %v3984_v56, %v3968_v9 }
 0x49d   :  { %v3843_v58 = vpop.permute.xlu1 %3842  ;;  %3576 = vmatprep.mubr.msk.bf16.mxu1 %vm4065_vm1, %v4064_v3 }
 0x49e   :  { %v3838_v59 = vpop.permute.xlu0 %3837  ;;  %v894_v60 = vpack.c.bf16 %v886_v57, %v886_v57  ;;  %v3844_v62 = vunpack.i.l.bf16 %v3843_v58  ;;  %v3845_v2 = vunpack.i.h.bf16 %v3843_v58 }
 0x49f   :  { %v3986_v61 = vpop.eup %3985  ;;  %v3840_v63 = vunpack.i.h.bf16 %v3838_v59  ;;  %v3839_v0 = vunpack.i.l.bf16 %v3838_v59 }
 0x4a0   :  { %v3988_v1 = vpop.eup %3987  ;;  %3571 = vmatmul.mubr.msk.bf16.vlgmr.msra.gmra.mxu0 %vm426_vm6, %v894_v60  ;;  %v887_v7 = vmul.f32 %v3986_v61, %v4305_v17  ;;  %v424_v10 = vpack.c.bf16 %v3844_v62, %v3844_v62  ;;  %v425_v13 = vpack.c.bf16 %v3845_v2, %v3845_v2 }
 0x4a1   :  { %v423_v55 = vpack.c.bf16 %v3840_v63, %v3840_v63  ;;  %v422_v4 = vpack.c.bf16 %v3839_v0, %v3839_v0  ;;  %3582 = vmatprep.mubr.msk.bf16.mxu0 %vm4065_vm1, %v4064_v3  ;;  %v888_v8 = vmul.f32 %v3988_v1, %v4307_v18 }
 0x4a2   :  { %v895_v5 = vpack.c.bf16 %v887_v7, %v887_v7  ;;  %v1179_v9 = vsel %vm105_vm0, %v424_v10, 0  ;;  %v1225_v17 = vsel %vm105_vm0, %v425_v13, 0 }
 0x4a3   :  { %v1087_v11 = vsel %vm105_vm0, %v422_v4, 0  ;;  %v1133_v12 = vsel %vm105_vm0, %v423_v55, 0  ;;  %v896_v14 = vpack.c.bf16 %v888_v8, %v888_v8 }
 0x4a4   :  { %3575 = vmatpush3.bf16.msra.mxu1 %v1087_v11  ;;  %3581 = vmatpush3.bf16.msra.mxu0 %v1133_v12 }
 0x4a5   :  { %3586 = vmatprep.subr.bf16.mxu1 %v4064_v3  ;;  %3592 = vmatprep.subr.bf16.mxu0 %v4064_v3 }
 0x4a7   :  { %v3990_v15 = vpop.eup %3989  ;;  %3577 = vmatmul.mubr.msk.bf16.vlgmr.msra.gmra.mxu1 %vm426_vm6, %v895_v5 }
 0x4a8   :  { %v3992_v16 = vpop.eup %3991  ;;  %3587 = vmatpush3.bf16.msra.mxu1 %v1179_v9  ;;  %3583 = vmatmul.mubr.msk.bf16.vlgmr.msra.gmra.mxu0 %vm426_vm6, %v896_v14  ;;  %v889_v18 = vmul.f32 %v3990_v15, %v4313_v21 }
 0x4a9   :  { %3593 = vmatpush3.bf16.msra.mxu0 %v1225_v17  ;;  %3588 = vmatprep.mubr.msk.bf16.mxu1 %vm4065_vm1, %v4064_v3  ;;  %v890_v19 = vmul.f32 %v3992_v16, %v4315_v22 }
 0x4aa   :  { %3594 = vmatprep.mubr.msk.bf16.mxu0 %vm4065_vm1, %v4064_v3  ;;  %3598 = vmatprep.subr.bf16.mxu1 %v4064_v3  ;;  %v897_v20 = vpack.c.bf16 %v889_v18, %v889_v18 }
 0x4ab   :  { %3606 = vmatprep.subr.bf16.mxu0 %v4064_v3  ;;  %v898_v23 = vpack.c.bf16 %v890_v19, %v890_v19  ;;  %v1307_v19 = vsub.s32 3, %v4201_v35 }
 0x4af   :  { %3589 = vmatmul.mubr.msk.bf16.vlgmr.msra.gmra.mxu1 %vm426_vm6, %v897_v20  ;;  %v1308_v20 = vrot.slane %v4209_v39, %v1307_v19 }
 0x4b0   :  { %3595 = vmatmul.mubr.msk.bf16.vlgmr.msra.gmra.mxu0 %vm426_vm6, %v898_v23  ;;  %3602 = vmatprep.mubr.msk.bf16.mxu1 %vm4065_vm1, %v4064_v3 }
 0x4b1   :  { %3610 = vmatprep.mubr.msk.bf16.mxu0 %vm4065_vm1, %v4064_v3  ;;  %3599 = vmatpush3.bf16.msra.mxu1 %v3935_v38 }
 0x4b2   :  { %3600 = vmatprep.subr.bf16.mxu1 %v4064_v3 }
 0x4b5   :  { %3601 = vmatpush3.bf16.msra.mxu1 %v3936_v46  ;;  %v3939_v46 = vld [vmem:[%s4754_s3 + $0x28] sm:$0xff]  }
 0x4b6   :  { %3614 = vmatprep.subr.bf16.mxu1 %v4064_v3 }
 0x4e5   :  { %v985_v21 = vpop.f32.mrf.mxu0 }
 0x4e7   :  { %v3560_v24 = vpop.f32.mrf.mxu0 }
 0x4e9   :  { %v988_v25 = vpop.f32.mrf.mxu0 }
 0x4eb   :  { %v3561_v22 = vpop.f32.mrf.mxu0 }
 0x504   :  { %v939_v26 = vpop.f32.mrf.mxu1 }
 0x506   :  { %v3554_v29 = vpop.f32.mrf.mxu1 }
 0x508   :  { %v942_v30 = vpop.f32.mrf.mxu1 }
 0x50a   :  { %v3555_v31 = vpop.f32.mrf.mxu1 }
 0x55c   :  { %v1031_v32 = vpop.f32.mrf.mxu1 }
 0x55e   :  { %v3566_v33 = vpop.f32.mrf.mxu1 }
 0x560   :  { %v1034_v34 = vpop.f32.mrf.mxu1  ;;  %v1077_v36 = vpop.f32.mrf.mxu0 }
 0x561   :  { %v3846_v40 = vpack.i.bf16 %v1077_v36, %v1031_v32 }
 0x562   :  { %v3567_v41 = vpop.f32.mrf.mxu1  ;;  %v3572_v42 = vpop.f32.mrf.mxu0 }
 0x563   :  { %3847 = vrot.lane.b32.xlu1 %v3846_v40, %s4069_s9 }
 0x564   :  { %v1080_v44 = vpop.f32.mrf.mxu0 }
 0x566   :  { %v3573_v45 = vpop.f32.mrf.mxu0 }
 0x567   :  { %v1123_v6 = vpop.f32.mrf.mxu1 }
 0x568   :  { %v1169_v47 = vpop.f32.mrf.mxu0 }
 0x569   :  { %v3578_v48 = vpop.f32.mrf.mxu1  ;;  %v3851_v49 = vpack.i.bf16 %v1169_v47, %v1123_v6  ;;  %v3938_v6 = vld [vmem:[%s4754_s3] sm:$0xff]  }
 0x56a   :  { %v3584_v50 = vpop.f32.mrf.mxu0 }
 0x56b   :  { %v1126_v51 = vpop.f32.mrf.mxu1  ;;  %3852 = vrot.lane.b32.xlu0 %v3851_v49, %s4070_s12 }
 0x56c   :  { %v1172_v53 = vpop.f32.mrf.mxu0 }
 0x56d   :  { %v3579_v54 = vpop.f32.mrf.mxu1 }
 0x56e   :  { %v3585_v56 = vpop.f32.mrf.mxu0  ;;  %v1396_v54 = vsub.s32 4, %v4201_v35 }
 0x56f   :  { %v1215_v57 = vpop.f32.mrf.mxu1 }
 0x570   :  { %v1261_v58 = vpop.f32.mrf.mxu0 }
 0x571   :  { %v3590_v59 = vpop.f32.mrf.mxu1  ;;  %v3856_v60 = vpack.i.bf16 %v1261_v58, %v1215_v57  ;;  %v1397_v58 = vrot.slane %v4209_v39, %v1396_v54 }
 0x572   :  { %v3596_v61 = vpop.f32.mrf.mxu0  ;;  %v1402_v59 = vsub.s32 5, %v4201_v35 }
 0x573   :  { %v1218_v62 = vpop.f32.mrf.mxu1  ;;  %3857 = vrot.lane.b32.xlu1 %v3856_v60, %s4071_s13 }
 0x574   :  { %v1264_v63 = vpop.f32.mrf.mxu0 }
 0x575   :  { %v3591_v0 = vpop.f32.mrf.mxu1  ;;  %v1403_v63 = vrot.slane %v4209_v39, %v1402_v59 }
 0x576   :  { %v3597_v1 = vpop.f32.mrf.mxu0 }
 0x5d5   :  { %v3848_v2 = vpop.permute.xlu1 %3847 }
 0x5d6   :  { %v3850_v4 = vunpack.i.h.bf16 %v3848_v2  ;;  %v3849_v7 = vunpack.i.l.bf16 %v3848_v2 }
 0x5d8   :  { %v1292_v12 = vsel %vm426_vm6, %v985_v21, %v3850_v4  ;;  %v1291_v13 = vsel %vm426_vm6, %v939_v26, %v3849_v7  ;;  %v3940_v4 = vld [vmem:[%s4754_s3 + $0x20] sm:$0xff]   ;;  %v3941_v7 = vld [vmem:[%s4754_s3 + $0x18] sm:$0xff]  }
 0x5dd   :  { %v3853_v55 = vpop.permute.xlu0 %3852 }
 0x5de   :  { %v3855_v8 = vunpack.i.h.bf16 %v3853_v55  ;;  %v3854_v10 = vunpack.i.l.bf16 %v3853_v55 }
 0x5e0   :  { %v1295_v15 = vsel %vm1293_vm7, %v1292_v12, %v3855_v8  ;;  %v1294_v9 = vsel %vm1293_vm7, %v1291_v13, %v3854_v10  ;;  %v3942_v8 = vld [vmem:[%s4754_s3 + $0x10] sm:$0xff]   ;;  %v1421_v10 = vsub.s32 6, %v4201_v35 }
 0x5e5   :  { %v3858_v11 = vpop.permute.xlu1 %3857 }
 0x5e6   :  { %v3860_v5 = vunpack.i.h.bf16 %v3858_v11  ;;  %v3859_v14 = vunpack.i.l.bf16 %v3858_v11  ;;  %v1422_v11 = vrot.slane %v4209_v39, %v1421_v10 }
 0x5e8   :  { %v1298_v16 = vsel %vm1296_vm8, %v1295_v15, %v3860_v5  ;;  %v1297_v17 = vsel %vm1296_vm8, %v1294_v9, %v3859_v14 }
 0x5e9   :  { %v1299_v18 = vpack.c.bf16 %v1298_v16, %v1297_v17 }
 0x5eb   :  { %3603 = vmatmul.mubr.msk.bf16.vlgmr.msra.gmra.mxu1 %vm173_vm5, %v1299_v18 }
 0x5ec   :  { %3622 = vmatprep.mubr.msk.bf16.mxu1 %vm4065_vm1, %v4064_v3  ;;  %3615 = vmatpush3.bf16.msra.mxu1 %v3939_v46  ;;  %v3945_v46 = vld [vmem:[%s4753_s2 + $0x40] sm:$0xff]  }
 0x5ed   :  { %3616 = vmatprep.subr.bf16.mxu1 %v4064_v3 }
 0x5f0   :  { %3617 = vmatpush3.bf16.msra.mxu1 %v3940_v4 }
 0x5f1   :  { %3618 = vmatprep.subr.bf16.mxu1 %v4064_v3 }
 0x5f4   :  { %3619 = vmatpush3.bf16.msra.mxu1 %v3941_v7  ;;  %v3947_v7 = vld [vmem:[%s4753_s2 + $0x58] sm:$0xff]  }
 0x5f5   :  { %3620 = vmatprep.subr.bf16.mxu1 %v4064_v3 }
 0x5f8   :  { %3621 = vmatpush3.bf16.msra.mxu1 %v3942_v8 }
 0x5f9   :  { %3642 = vmatprep.subr.bf16.mxu1 %v4064_v3 }
 0x6ab   :  { %v1358_v23 = vpop.f32.mrf.mxu1 }
 0x6ac   :  { %v1359_v21 = vadd.f32 %v1358_v23, %v1308_v20 }
 0x6ad   :  { %v3604_v24 = vpop.f32.mrf.mxu1 }
 0x6ae   :  { %v1365_v25 = vadd.f32 %v1359_v21, %v4170_v27 }
 0x6af   :  { %v1361_v22 = vpop.f32.mrf.mxu1 }
 0x6b0   :  { %v1362_v26 = vadd.f32 %v1361_v22, %v1308_v20  ;;  %v1367_v29 = vsel %vm173_vm5, %v1365_v25, 0.0  ;;  %v1484_v20 = vsub.s32 7, %v4201_v35 }
 0x6b1   :  { %1368 = vadd.xlane.f32.xlu0 %v1367_v29  ;;  %v3605_v30 = vpop.f32.mrf.mxu1 }
 0x6b2   :  { %v1366_v31 = vadd.f32 %v1362_v26, %v4172_v28  ;;  %v3937_v28 = vld [vmem:[%s4754_s3 + $0x8] sm:$0xff]   ;;  %v1485_v23 = vrot.slane %v4209_v39, %v1484_v20 }
 0x6b3   :  { %3607 = vmatpush3.bf16.msra.mxu0 %v3937_v28  ;;  %v3943_v28 = vld [vmem:[%s4753_s2 + $0x48] sm:$0xff]  }
 0x6b4   :  { %v1370_v32 = vsel %vm173_vm5, %v1366_v31, 0.0  ;;  %3608 = vmatprep.subr.bf16.mxu0 %v4064_v3 }
 0x6b5   :  { %1371 = vadd.xlane.f32.xlu1 %v1370_v32 }
 0x6b7   :  { %3609 = vmatpush3.bf16.msra.mxu0 %v3938_v6  ;;  %v3944_v6 = vld [vmem:[%s4753_s2 + $0x68] sm:$0xff]  }
 0x6b8   :  { %3626 = vmatprep.subr.bf16.mxu0 %v4064_v3 }
 0x73a   :  { %v1369_v33 = vpop.xlane.xlu0 %1368 }
 0x73b   :  { %v1374_v34 = vmul.f32 0.03125, %v1369_v33 }
 0x73d   :  { %v1376_v36 = vsub.f32 %v1365_v25, %v1374_v34 }
 0x73e   :  { %v1372_v38 = vpop.xlane.xlu1 %1371 }
 0x73f   :  { %v1375_v40 = vmul.f32 0.03125, %v1372_v38  ;;  %v1378_v41 = vmul.f32 %v1376_v36, %v1376_v36 }
 0x741   :  { %v1377_v42 = vsub.f32 %v1366_v31, %v1375_v40  ;;  %v1380_v27 = vsel %vm173_vm5, %v1378_v41, 0.0 }
 0x742   :  { %1381 = vadd.xlane.f32.xlu0 %v1380_v27 }
 0x743   :  { %v1379_v44 = vmul.f32 %v1377_v42, %v1377_v42 }
 0x745   :  { %v1383_v45 = vsel %vm173_vm5, %v1379_v44, 0.0 }
 0x746   :  { %1384 = vadd.xlane.f32.xlu0 %v1383_v45 }
 0x7cb   :  { %v1382_v47 = vpop.xlane.xlu0 %1381 }
 0x7cc   :  { %v1386_v48 = vmul.f32 0.03125, %v1382_v47  ;;  %v3946_v47 = vld [vmem:[%s4753_s2 + $0x60] sm:$0xff]  }
 0x7ce   :  { %v1388_v49 = vadd.f32 1e-06, %v1386_v48 }
 0x7cf   :  { %v1385_v50 = vpop.xlane.xlu0 %1384 }
 0x7d0   :  { %3993 = vrsqrt.f32 %v1388_v49  ;;  %v1387_v51 = vmul.f32 0.03125, %v1385_v50 }
 0x7d2   :  { %v1389_v53 = vadd.f32 1e-06, %v1387_v51 }
 0x7d4   :  { %3995 = vrsqrt.f32 %v1389_v53 }
 0x7dd   :  { %v3994_v56 = vpop.eup %3993 }
 0x7de   :  { %v1392_v57 = vmul.f32 %v3994_v56, %v1376_v36 }
 0x7e0   :  { %v1398_v62 = vmul.f32 %v1397_v58, %v1392_v57  ;;  %v151_v57 = vld [vmem:[%s4756_s5 + $0x8] sm:$0xff] }
 0x7e1   :  { %v3996_v60 = vpop.eup %3995 }
 0x7e2   :  { %v1393_v61 = vmul.f32 %v3996_v60, %v1377_v42  ;;  %v1404_v1 = vadd.f32 %v1403_v63, %v1398_v62 }
 0x7e4   :  { %v1399_v0 = vmul.f32 %v1397_v58, %v1393_v61  ;;  %v1586_v61 = vrot.slane %v151_v57, %v4214_v43 }
 0x7e6   :  { %v1405_v2 = vadd.f32 %v1403_v63, %v1399_v0 }
 0x7e8   :  { %v1418_v55 = vpack.c.bf16 %v1405_v2, %v1404_v1 }
 0x7ea   :  { %3611 = vmatmul.mubr.msk.bf16.vlgmr.msra.gmra.mxu0 %vm173_vm5, %v1418_v55 }
 0x7eb   :  { %3630 = vmatprep.mubr.msk.bf16.mxu0 %vm4065_vm1, %v4064_v3  ;;  %3627 = vmatpush3.bf16.msra.mxu0 %v3943_v28 }
 0x7ec   :  { %3628 = vmatprep.subr.bf16.mxu0 %v4064_v3 }
 0x7ef   :  { %3629 = vmatpush3.bf16.msra.mxu0 %v3945_v46 }
 0x7f0   :  { %3634 = vmatprep.subr.bf16.mxu0 %v4064_v3 }
 0x8aa   :  { %v1472_v12 = vpop.f32.mrf.mxu0 }
 0x8ab   :  { %v1473_v5 = vadd.f32 %v1472_v12, %v1422_v11  ;;  %v4493_v12 = vld [vmem:[%s4756_s5 + $0x10] sm:$0xff] }
 0x8ac   :  { %v3612_v13 = vpop.f32.mrf.mxu0 }
 0x8ad   :  { %v1479_v16 = vmax.f32 %v1473_v5, 0.0 }
 0x8ae   :  { %v1475_v14 = vpop.f32.mrf.mxu0 }
 0x8af   :  { %v1476_v15 = vadd.f32 %v1475_v14, %v1422_v11  ;;  %v3948_v11 = vld [vmem:[%s4753_s2 + $0x50] sm:$0xff]   ;;  %v1607_v14 = vrot.slane %v4493_v12, %v4214_v43 }
 0x8b0   :  { %v3613_v9 = vpop.f32.mrf.mxu0 }
 0x8b1   :  { %v1480_v17 = vmax.f32 %v1476_v15, 0.0  ;;  %v1734_v15 = vrot.slane %v4493_v12, %v287_v52 }
 0x8b3   :  { %v1481_v18 = vpack.c.bf16 %v1480_v17, %v1479_v16 }
 0x8b5   :  { %3623 = vmatmul.mubr.msk.bf16.vlgmr.msra.gmra.mxu1 %vm1510_vm9, %v1481_v18 }
 0x8b6   :  { %3646 = vmatprep.mubr.msk.bf16.mxu1 %vm4065_vm1, %v4064_v3  ;;  %3643 = vmatpush3.bf16.msra.mxu1 %v3944_v6 }
 0x8b7   :  { %3644 = vmatprep.subr.bf16.mxu1 %v4064_v3 }
 0x8ba   :  { %3645 = vmatpush3.bf16.msra.mxu1 %v3946_v47 }
 0x8bb   :  { %3656 = vmatprep.subr.bf16.mxu1 %v4064_v3 }
 0x975   :  { %v1548_v21 = vpop.f32.mrf.mxu1 }
 0x976   :  { %v1549_v24 = vadd.f32 %v1548_v21, %v1485_v23 }
 0x977   :  { %v3624_v25 = vpop.f32.mrf.mxu1 }
 0x978   :  { %v1555_v22 = vadd.f32 %v1549_v24, %v1404_v1  ;;  %v1592_v1 = vrot.slane %v151_v57, %v4204_v37  ;;  %v1672_v25 = vrot.slane %v4493_v12, %v4204_v37 }
 0x979   :  { %v1551_v26 = vpop.f32.mrf.mxu1 }
 0x97a   :  { %v1552_v29 = vadd.f32 %v1551_v26, %v1485_v23  ;;  %v1557_v30 = vsel %vm173_vm5, %v1555_v22, 0.0 }
 0x97b   :  { %1558 = vadd.xlane.f32.xlu1 %v1557_v30  ;;  %v3625_v31 = vpop.f32.mrf.mxu1 }
 0x97c   :  { %v1556_v32 = vadd.f32 %v1552_v29, %v1405_v2 }
 0x97e   :  { %v1560_v33 = vsel %vm173_vm5, %v1556_v32, 0.0 }
 0x97f   :  { %1561 = vadd.xlane.f32.xlu0 %v1560_v33 }
 0xa04   :  { %v1559_v34 = vpop.xlane.xlu1 %1558 }
 0xa05   :  { %v1563_v36 = vmul.f32 0.03125, %v1559_v34 }
 0xa07   :  { %v1565_v38 = vsub.f32 %v1555_v22, %v1563_v36 }
 0xa08   :  { %v1562_v40 = vpop.xlane.xlu0 %1561 }
 0xa09   :  { %v1564_v41 = vmul.f32 0.03125, %v1562_v40  ;;  %v1567_v39 = vmul.f32 %v1565_v38, %v1565_v38 }
 0xa0b   :  { %v1566_v42 = vsub.f32 %v1556_v32, %v1564_v41  ;;  %v1569_v27 = vsel %vm173_vm5, %v1567_v39, 0.0 }
 0xa0c   :  { %1570 = vadd.xlane.f32.xlu1 %v1569_v27 }
 0xa0d   :  { %v1568_v44 = vmul.f32 %v1566_v42, %v1566_v42 }
 0xa0f   :  { %v1572_v45 = vsel %vm173_vm5, %v1568_v44, 0.0 }
 0xa10   :  { %1573 = vadd.xlane.f32.xlu0 %v1572_v45 }
 0xa95   :  { %v1571_v48 = vpop.xlane.xlu1 %1570 }
 0xa96   :  { %v1575_v49 = vmul.f32 0.03125, %v1571_v48 }
 0xa98   :  { %v1577_v50 = vadd.f32 1e-06, %v1575_v49 }
 0xa99   :  { %v1574_v51 = vpop.xlane.xlu0 %1573 }
 0xa9a   :  { %3997 = vrsqrt.f32 %v1577_v50  ;;  %v1576_v53 = vmul.f32 0.03125, %v1574_v51 }
 0xa9c   :  { %v1578_v56 = vadd.f32 1e-06, %v1576_v53 }
 0xa9e   :  { %3999 = vrsqrt.f32 %v1578_v56 }
 0xaa7   :  { %v3998_v58 = vpop.eup %3997 }
 0xaa8   :  { %v1581_v60 = vmul.f32 %v3998_v58, %v1565_v38 }
 0xaaa   :  { %v1587_v0 = vmul.f32 %v1586_v61, %v1581_v60 }
 0xaab   :  { %v4000_v62 = vpop.eup %3999 }
 0xaac   :  { %v1582_v63 = vmul.f32 %v4000_v62, %v1566_v42  ;;  %v4467_v55 = vadd.f32 %v1592_v1, %v1587_v0 }
 0xaae   :  { %v1588_v2 = vmul.f32 %v1586_v61, %v1582_v63 }
 0xab0   :  { %v4469_v4 = vadd.f32 %v1592_v1, %v1588_v2 }
 0xab2   :  { %v1598_v8 = vpack.c.bf16 %v4469_v4, %v4467_v55 }
 0xab4   :  { %3631 = vmatmul.mubr.msk.bf16.vlgmr.msra.gmra.mxu0 %vm173_vm5, %v1598_v8  ;;  %3647 = vmatmul.mubr.msk.bf16.vlgmr.msra.gmra.mxu1 %vm173_vm5, %v1598_v8 }
 0xab5   :  { %3635 = vmatpush3.bf16.msra.mxu0 %v3947_v7  ;;  %3638 = vmatprep.mubr.msk.bf16.mxu0 %vm4065_vm1, %v4064_v3 }
 0xab6   :  { %3636 = vmatprep.subr.bf16.mxu0 %v4064_v3  ;;  %3658 = vmatprep.mubr.msk.bf16.mxu1 %vm4065_vm1, %v4064_v3 }
 0xab9   :  { %3637 = vmatpush3.bf16.msra.mxu0 %v3948_v11 }
 0xaba   :  { %3650 = vmatprep.subr.bf16.mxu0 %v4064_v3 }
 0xabc   :  { %3639 = vmatmul.mubr.msk.bf16.vlgmr.msra.gmra.mxu0 %vm173_vm5, %v1598_v8 }
 0xabd   :  { %3652 = vmatprep.mubr.msk.bf16.mxu0 %vm4065_vm1, %v4064_v3 }
 0xb74   :  { %v1657_v13 = vpop.f32.mrf.mxu0  ;;  %v1781_v5 = vpop.f32.mrf.mxu1 }
 0xb75   :  { %v1658_v23 = vadd.f32 %v1657_v13, %v1607_v14  ;;  %v4504_v22 = vadd.f32 %v1781_v5, %v1734_v15 }
 0xb76   :  { %v3632_v9 = vpop.f32.mrf.mxu0  ;;  %v3648_v16 = vpop.f32.mrf.mxu1 }
 0xb77   :  { %v1808_v44 = vpack.c.bf16 %v1658_v23, %v1658_v23 }
 0xb78   :  { %v1660_v17 = vpop.f32.mrf.mxu0  ;;  %v1784_v18 = vpop.f32.mrf.mxu1 }
 0xb79   :  { %v1661_v21 = vadd.f32 %v1660_v17, %v1607_v14  ;;  %v4500_v24 = vadd.f32 %v1784_v18, %v1734_v15 }
 0xb7a   :  { %v3633_v26 = vpop.f32.mrf.mxu0  ;;  %v3649_v29 = vpop.f32.mrf.mxu1 }
 0xb7b   :  { %v3866_v30 = vpack.i.bf16 %v1661_v21, %v1658_v23  ;;  %v4508_v52 = vpack.i.bf16 %v4500_v24, %v4504_v22  ;;  %v1809_v45 = vpack.c.bf16 %v1661_v21, %v1661_v21  ;;  %v1864_v29 = vpack.c.bf16 %v4504_v22, %v4504_v22 }
 0xb7c   :  { %v1719_v31 = vpop.f32.mrf.mxu0 }
 0xb7d   :  { %v1720_v32 = vadd.f32 %v1719_v31, %v1672_v25  ;;  %3867 = vrot.lane.b32.xlu0 %v3866_v30, %s4067_s30 }
 0xb7e   :  { %v3640_v33 = vpop.f32.mrf.mxu0 }
 0xb7f   :  { %v1836_v34 = vpack.c.bf16 %v1720_v32, %v1720_v32  ;;  %v2348_v33 = vsel %vm105_vm0, %v1864_v29, 0 }
 0xb80   :  { %v1722_v36 = vpop.f32.mrf.mxu0 }
 0xb81   :  { %v1723_v38 = vadd.f32 %v1722_v36, %v1672_v25  ;;  %v1876_v40 = vsel %vm426_vm6, %v1836_v34, 0 }
 0xb82   :  { %v3641_v41 = vpop.f32.mrf.mxu0  ;;  %3651 = vmatpush3.bf16.xpose.msra.mxu0 %v1876_v40 }
 0xb83   :  { %v3881_v39 = vpack.i.bf16 %v1723_v38, %v1720_v32  ;;  %v1837_v42 = vpack.c.bf16 %v1723_v38, %v1723_v38  ;;  %3662 = vmatprep.subr.bf16.mxu0 %v4064_v3 }
 0xb85   :  { %3882 = vrot.lane.b32.xlu0 %v3881_v39, %s4068_s0  ;;  %3862 = vrot.lane.b32.xlu1 %v3881_v39, %s4067_s30  ;;  %v1922_v27 = vsel %vm426_vm6, %v1837_v42, 0 }
 0xb86   :  { %3657 = vmatpush3.bf16.xpose.msra.mxu1 %v1922_v27 }
 0xb87   :  { %3668 = vmatprep.subr.bf16.mxu1 %v4064_v3 }
 0xb89   :  { %3653 = vmatmul.mubr.msk.bf16.vlgmr.msra.gmra.mxu0 %vm426_vm6, %v1808_v44  ;;  %3872 = vrot.lane.b32.xlu1 %v3881_v39, %s4066_s29 }
 0xb8a   :  { %3664 = vmatprep.mubr.msk.bf16.mxu0 %vm4065_vm1, %v4064_v3 }
 0xb8d   :  { %3877 = vrot.lane.b32.xlu1 %v3866_v30, %s4066_s29  ;;  %3659 = vmatmul.mubr.msk.bf16.vlgmr.msra.gmra.mxu1 %vm426_vm6, %v1809_v45 }
 0xb8e   :  { %3670 = vmatprep.mubr.msk.bf16.mxu1 %vm4065_vm1, %v4064_v3 }
 0xb91   :  { %3887 = vrot.lane.b32.xlu1 %v3866_v30, %s4068_s0  ;;  %v1865_v30 = vpack.c.bf16 %v4500_v24, %v4500_v24 }
 0xb93   :  { %v2394_v34 = vsel %vm105_vm0, %v1865_v30, 0 }
 0xbef   :  { %v3868_v49 = vpop.permute.xlu0 %3867 }
 0xbf0   :  { %v3870_v58 = vunpack.i.h.bf16 %v3868_v49  ;;  %v3869_v60 = vunpack.i.l.bf16 %v3868_v49 }
 0xbf2   :  { %v1811_v0 = vpack.c.bf16 %v3870_v58, %v3870_v58  ;;  %v1810_v1 = vpack.c.bf16 %v3869_v60, %v3869_v60 }
 0xbf7   :  { %v3863_v28 = vpop.permute.xlu1 %3862  ;;  %v3883_v63 = vpop.permute.xlu0 %3882 }
 0xbf8   :  { %v3865_v6 = vunpack.i.h.bf16 %v3863_v28  ;;  %v3864_v46 = vunpack.i.l.bf16 %v3863_v28  ;;  %v3885_v7 = vunpack.i.h.bf16 %v3883_v63  ;;  %v3884_v8 = vunpack.i.l.bf16 %v3883_v63 }
 0xbfa   :  { %v1839_v47 = vpack.c.bf16 %v3865_v6, %v3865_v6  ;;  %v1838_v48 = vpack.c.bf16 %v3864_v46, %v3864_v46  ;;  %v1843_v15 = vpack.c.bf16 %v3885_v7, %v3885_v7  ;;  %v1842_v9 = vpack.c.bf16 %v3884_v8, %v3884_v8 }
 0xbfb   :  { %v3873_v50 = vpop.permute.xlu1 %3872 }
 0xbfc   :  { %v3875_v51 = vunpack.i.h.bf16 %v3873_v50  ;;  %v3874_v53 = vunpack.i.l.bf16 %v3873_v50  ;;  %v1968_v56 = vsel %vm426_vm6, %v1838_v48, 0  ;;  %v2014_v57 = vsel %vm426_vm6, %v1839_v47, 0 }
 0xbfd   :  { %3663 = vmatpush3.bf16.xpose.msra.mxu0 %v1968_v56  ;;  %3669 = vmatpush3.bf16.xpose.msra.mxu1 %v2014_v57  ;;  %v2152_v23 = vsel %vm426_vm6, %v1842_v9, 0  ;;  %v2198_v21 = vsel %vm426_vm6, %v1843_v15, 0 }
 0xbfe   :  { %3674 = vmatprep.subr.bf16.mxu0 %v4064_v3  ;;  %3680 = vmatprep.subr.bf16.mxu1 %v4064_v3  ;;  %v1841_v61 = vpack.c.bf16 %v3875_v51, %v3875_v51  ;;  %v1840_v62 = vpack.c.bf16 %v3874_v53, %v3874_v53 }
 0xbff   :  { %v3878_v2 = vpop.permute.xlu1 %3877 }
 0xc00   :  { %v2060_v11 = vsel %vm426_vm6, %v1840_v62, 0  ;;  %v2106_v13 = vsel %vm426_vm6, %v1841_v61, 0  ;;  %v3880_v5 = vunpack.i.h.bf16 %v3878_v2  ;;  %v3879_v14 = vunpack.i.l.bf16 %v3878_v2 }
 0xc02   :  { %v1813_v16 = vpack.c.bf16 %v3880_v5, %v3880_v5  ;;  %v1812_v17 = vpack.c.bf16 %v3879_v14, %v3879_v14 }
 0xc03   :  { %v3888_v18 = vpop.permute.xlu1 %3887 }
 0xc04   :  { %3665 = vmatmul.mubr.msk.bf16.vlgmr.msra.gmra.mxu0 %vm426_vm6, %v1810_v1  ;;  %3671 = vmatmul.mubr.msk.bf16.vlgmr.msra.gmra.mxu1 %vm426_vm6, %v1811_v0  ;;  %v3890_v25 = vunpack.i.h.bf16 %v3888_v18  ;;  %v3889_v26 = vunpack.i.l.bf16 %v3888_v18 }
 0xc05   :  { %3675 = vmatpush3.bf16.xpose.msra.mxu0 %v2060_v11  ;;  %3681 = vmatpush3.bf16.xpose.msra.mxu1 %v2106_v13 }
 0xc06   :  { %3676 = vmatprep.mubr.msk.bf16.mxu0 %vm4065_vm1, %v4064_v3  ;;  %3682 = vmatprep.mubr.msk.bf16.mxu1 %vm4065_vm1, %v4064_v3  ;;  %v1815_v31 = vpack.c.bf16 %v3890_v25, %v3890_v25  ;;  %v1814_v32 = vpack.c.bf16 %v3889_v26, %v3889_v26 }
 0xc07   :  { %3686 = vmatprep.subr.bf16.mxu0 %v4064_v3  ;;  %3692 = vmatprep.subr.bf16.mxu1 %v4064_v3 }
 0xc0c   :  { %3677 = vmatmul.mubr.msk.bf16.vlgmr.msra.gmra.mxu0 %vm426_vm6, %v1812_v17  ;;  %3683 = vmatmul.mubr.msk.bf16.vlgmr.msra.gmra.mxu1 %vm426_vm6, %v1813_v16 }
 0xc0d   :  { %3687 = vmatpush3.bf16.xpose.msra.mxu0 %v2152_v23  ;;  %3693 = vmatpush3.bf16.xpose.msra.mxu1 %v2198_v21 }
 0xc0e   :  { %3688 = vmatprep.mubr.msk.bf16.mxu0 %vm4065_vm1, %v4064_v3  ;;  %3694 = vmatprep.mubr.msk.bf16.mxu1 %vm4065_vm1, %v4064_v3 }
 0xc0f   :  { %3698 = vmatprep.subr.bf16.mxu0 %v4064_v3  ;;  %3704 = vmatprep.subr.bf16.mxu1 %v4064_v3 }
 0xc14   :  { %3689 = vmatmul.mubr.msk.bf16.vlgmr.msra.gmra.mxu0 %vm426_vm6, %v1814_v32  ;;  %3695 = vmatmul.mubr.msk.bf16.vlgmr.msra.gmra.mxu1 %vm426_vm6, %v1815_v31 }
 0xc15   :  { %3699 = vmatpush3.bf16.msra.mxu0 %v2348_v33  ;;  %3705 = vmatpush3.bf16.msra.mxu1 %v2394_v34 }
 0xc16   :  { %3706 = vmatprep.mubr.msk.bf16.mxu1 %vm4065_vm1, %v4064_v3  ;;  %3716 = vmatprep.subr.bf16.mxu1 %v4064_v3 }
 0xc17   :  { %3700 = vmatprep.mubr.msk.bf16.mxu0 %vm4065_vm1, %v4064_v3  ;;  %3710 = vmatprep.subr.bf16.mxu0 %v4064_v3 }
 0xc49   :  { %v1912_v24 = vpop.f32.mrf.mxu0 }
 0xc4a   :  { %v4564_v22 = vmul.f32 0.35355338, %v1912_v24 }
 0xc4b   :  { %v3654_v36 = vpop.f32.mrf.mxu0 }
 0xc4c   :  { %v2248_v38 = vsel %vm426_vm6, %v4564_v22, -inf }
 0xc4d   :  { %v1958_v40 = vpop.f32.mrf.mxu1  ;;  %2249 = vmax.xlane.f32.xlu0 %v2248_v38  ;;  %v1915_v41 = vpop.f32.mrf.mxu0 }
 0xc4e   :  { %v2241_v39 = vmul.f32 0.35355338, %v1958_v40 }
 0xc4f   :  { %v3655_v42 = vpop.f32.mrf.mxu0  ;;  %v3660_v27 = vpop.f32.mrf.mxu1 }
 0xc50   :  { %v2251_v44 = vsel %vm426_vm6, %v2241_v39, -inf }
 0xc51   :  { %2252 = vmax.xlane.f32.xlu1 %v2251_v44  ;;  %v1961_v45 = vpop.f32.mrf.mxu1 }
 0xc53   :  { %v3661_v28 = vpop.f32.mrf.mxu1 }
 0xcc4   :  { %v2004_v6 = vpop.f32.mrf.mxu0  ;;  %v2050_v46 = vpop.f32.mrf.mxu1 }
 0xcc5   :  { %v2242_v47 = vmul.f32 0.35355338, %v2004_v6  ;;  %v2243_v50 = vmul.f32 0.35355338, %v2050_v46 }
 0xcc6   :  { %v3666_v48 = vpop.f32.mrf.mxu0  ;;  %v3672_v49 = vpop.f32.mrf.mxu1 }
 0xcc7   :  { %v2254_v51 = vsel %vm426_vm6, %v2242_v47, -inf  ;;  %v2257_v60 = vsel %vm426_vm6, %v2243_v50, -inf }
 0xcc8   :  { %v2053_v53 = vpop.f32.mrf.mxu1  ;;  %2255 = vmax.xlane.f32.xlu0 %v2254_v51  ;;  %v2007_v56 = vpop.f32.mrf.mxu0 }
 0xcca   :  { %v3667_v57 = vpop.f32.mrf.mxu0  ;;  %v3673_v58 = vpop.f32.mrf.mxu1 }
 0xccc   :  { %v2142_v61 = vpop.f32.mrf.mxu1  ;;  %2258 = vmax.xlane.f32.xlu0 %v2257_v60  ;;  %v2096_v62 = vpop.f32.mrf.mxu0 }
 0xccd   :  { %v2245_v63 = vmul.f32 0.35355338, %v2142_v61  ;;  %v2244_v0 = vmul.f32 0.35355338, %v2096_v62 }
 0xcce   :  { %v3678_v1 = vpop.f32.mrf.mxu0  ;;  %v3684_v2 = vpop.f32.mrf.mxu1 }
 0xccf   :  { %v2263_v7 = vsel %vm426_vm6, %v2245_v63, -inf  ;;  %v2260_v8 = vsel %vm426_vm6, %v2244_v0, -inf }
 0xcd0   :  { %v2145_v11 = vpop.f32.mrf.mxu1  ;;  %2264 = vmax.xlane.f32.xlu0 %v2263_v7  ;;  %2261 = vmax.xlane.f32.xlu1 %v2260_v8  ;;  %v2099_v13 = vpop.f32.mrf.mxu0 }
 0xcd2   :  { %v3679_v5 = vpop.f32.mrf.mxu0  ;;  %v3685_v14 = vpop.f32.mrf.mxu1 }
 0xcd4   :  { %v2188_v15 = vpop.f32.mrf.mxu0  ;;  %v2234_v9 = vpop.f32.mrf.mxu1 }
 0xcd5   :  { %v2246_v16 = vmul.f32 0.35355338, %v2188_v15  ;;  %v2247_v17 = vmul.f32 0.35355338, %v2234_v9 }
 0xcd6   :  { %v3696_v18 = vpop.f32.mrf.mxu1  ;;  %v3690_v23 = vpop.f32.mrf.mxu0 }
 0xcd7   :  { %v2269_v21 = vsel %vm426_vm6, %v2247_v17, -inf  ;;  %v2266_v25 = vsel %vm426_vm6, %v2246_v16, -inf  ;;  %v2250_v38 = vpop.xlane.xlu0 %2249 }
 0xcd8   :  { %v2237_v26 = vpop.f32.mrf.mxu1  ;;  %2270 = vmax.xlane.f32.xlu0 %v2269_v21  ;;  %2267 = vmax.xlane.f32.xlu1 %v2266_v25  ;;  %v2191_v29 = vpop.f32.mrf.mxu0  ;;  %v2272_v40 = vsub.f32 %v4564_v22, %v2250_v38 }
 0xcda   :  { %v2253_v30 = vpop.xlane.xlu1 %2252  ;;  %v3697_v31 = vpop.f32.mrf.mxu1  ;;  %v2280_v41 = vmul.f32 1.442695, %v2272_v40 }
 0xcdb   :  { %v2273_v32 = vsub.f32 %v2241_v39, %v2253_v30  ;;  %v3691_v33 = vpop.f32.mrf.mxu0 }
 0xcdd   :  { %v2282_v34 = vmul.f32 1.442695, %v2273_v32 }
 0xcdf   :  { %4001 = vpow2.f32 %v2282_v34 }
 0xce0   :  { %4003 = vpow2.f32 %v2280_v41 }
 0xce9   :  { %3892 = vrot.lane.b32.xlu1 %v4508_v52, %s4067_s30 }
 0xcec   :  { %v4002_v24 = vpop.eup %4001 }
 0xced   :  { %v2299_v36 = vsel %vm426_vm6, %v4002_v24, 0.0  ;;  %v4579_v42 = vpop.eup %4003 }
 0xcee   :  { %2300 = vadd.xlane.f32.xlu0 %v2299_v36  ;;  %v2296_v39 = vsel %vm426_vm6, %v4579_v42, 0.0 }
 0xd0d   :  { %2297 = vadd.xlane.f32.xlu1 %v2296_v39 }
 0xd51   :  { %v2256_v27 = vpop.xlane.xlu0 %2255 }
 0xd52   :  { %v2274_v44 = vsub.f32 %v2242_v47, %v2256_v27 }
 0xd54   :  { %v2284_v45 = vmul.f32 1.442695, %v2274_v44 }
 0xd55   :  { %v2259_v28 = vpop.xlane.xlu0 %2258 }
 0xd56   :  { %4005 = vpow2.f32 %v2284_v45  ;;  %v2275_v6 = vsub.f32 %v2243_v50, %v2259_v28 }
 0xd58   :  { %v2286_v46 = vmul.f32 1.442695, %v2275_v6 }
 0xd59   :  { %v2265_v48 = vpop.xlane.xlu0 %2264  ;;  %v2262_v49 = vpop.xlane.xlu1 %2261 }
 0xd5a   :  { %4007 = vpow2.f32 %v2286_v46  ;;  %v2277_v51 = vsub.f32 %v2245_v63, %v2265_v48  ;;  %v2276_v22 = vsub.f32 %v2244_v0, %v2262_v49 }
 0xd5c   :  { %v2290_v53 = vmul.f32 1.442695, %v2277_v51  ;;  %v2288_v56 = vmul.f32 1.442695, %v2276_v22 }
 0xd5e   :  { %4009 = vpow2.f32 %v2290_v53 }
 0xd5f   :  { %4011 = vpow2.f32 %v2288_v56 }
 0xd61   :  { %v2271_v57 = vpop.xlane.xlu0 %2270  ;;  %v2268_v58 = vpop.xlane.xlu1 %2267 }
 0xd62   :  { %v2279_v60 = vsub.f32 %v2247_v17, %v2271_v57  ;;  %v2278_v61 = vsub.f32 %v2246_v16, %v2268_v58 }
 0xd63   :  { %v4006_v62 = vpop.eup %4005 }
 0xd64   :  { %v2294_v47 = vmul.f32 1.442695, %v2279_v60  ;;  %v2292_v1 = vmul.f32 1.442695, %v2278_v61  ;;  %v2302_v2 = vsel %vm426_vm6, %v4006_v62, 0.0 }
 0xd65   :  { %2303 = vadd.xlane.f32.xlu1 %v2302_v2  ;;  %v3893_v16 = vpop.permute.xlu1 %3892 }
 0xd66   :  { %4013 = vpow2.f32 %v2294_v47  ;;  %v3895_v17 = vunpack.i.h.bf16 %v3893_v16  ;;  %v3894_v30 = vunpack.i.l.bf16 %v3893_v16 }
 0xd67   :  { %v4008_v50 = vpop.eup %4007  ;;  %4015 = vpow2.f32 %v2292_v1 }
 0xd68   :  { %v2305_v63 = vsel %vm426_vm6, %v4008_v50, 0.0  ;;  %v1867_v23 = vpack.c.bf16 %v3895_v17, %v3895_v17  ;;  %v1866_v32 = vpack.c.bf16 %v3894_v30, %v3894_v30 }
 0xd69   :  { %2306 = vadd.xlane.f32.xlu0 %v2305_v63 }
 0xd6a   :  { %v2486_v26 = vsel %vm105_vm0, %v1867_v23, 0 }
 0xd6b   :  { %v4585_v0 = vpop.eup %4009 }
 0xd6c   :  { %v4587_v7 = vpop.eup %4011  ;;  %v2311_v8 = vsel %vm426_vm6, %v4585_v0, 0.0 }
 0xd6d   :  { %2312 = vadd.xlane.f32.xlu0 %v2311_v8  ;;  %v2308_v11 = vsel %vm426_vm6, %v4587_v7, 0.0 }
 0xd6e   :  { %2309 = vadd.xlane.f32.xlu1 %v2308_v11 }
 0xd73   :  { %v4593_v13 = vpop.eup %4013 }
 0xd74   :  { %v4595_v5 = vpop.eup %4015  ;;  %v2317_v14 = vsel %vm426_vm6, %v4593_v13, 0.0 }
 0xd75   :  { %2318 = vadd.xlane.f32.xlu0 %v2317_v14  ;;  %v2314_v15 = vsel %vm426_vm6, %v4595_v5, 0.0 }
 0xd76   :  { %2315 = vadd.xlane.f32.xlu1 %v2314_v15 }
 0xd77   :  { %v2301_v9 = vpop.xlane.xlu0 %2300 }
 0xd78   :  { %4017 = vrcp.f32 %v2301_v9 }
 0xd85   :  { %v4018_v18 = vpop.eup %4017 }
 0xd86   :  { %v2329_v21 = vmul.f32 %v4018_v18, %v4002_v24  ;;  %v2440_v24 = vsel %vm105_vm0, %v1866_v32, 0 }
 0xd87   :  { %3902 = vrot.lane.b32.xlu1 %v4508_v52, %s4068_s0 }
 0xd88   :  { %v2337_v25 = vpack.c.bf16 %v2329_v21, %v2329_v21 }
 0xd8a   :  { %3707 = vmatmul.mubr.msk.bf16.vlgmr.msra.gmra.mxu1 %vm426_vm6, %v2337_v25 }
 0xd8b   :  { %3717 = vmatpush3.bf16.msra.mxu1 %v2486_v26  ;;  %3897 = vrot.lane.b32.xlu0 %v4508_v52, %s4066_s29  ;;  %s4072_s29 = smov [#allocation2]  }
 0xd8c   :  { %3718 = vmatprep.mubr.msk.bf16.mxu1 %vm4065_vm1, %v4064_v3  ;;  %3728 = vmatprep.subr.bf16.mxu1 %v4064_v3  ;;  %s3201_s30 = sshll.u32 %s4072_s29, 4  ;;  %s3202_s30 = int_to_ptr.vmem [resolvable:$true] %s3201_s30 }
 0xd8d   :  { %p4046_p1 = scmp.lt.s32.totalorder %s3202_s30, %s3202_s30 }
 0xd96   :  { %v2298_v29 = vpop.xlane.xlu1 %2297 }
 0xd97   :  { %4019 = vrcp.f32 %v2298_v29 }
 0xda4   :  { %v4020_v31 = vpop.eup %4019 }
 0xda5   :  { %v2328_v33 = vmul.f32 %v4020_v31, %v4579_v42 }
 0xda7   :  { %v2336_v34 = vpack.c.bf16 %v2328_v33, %v2328_v33 }
 0xda9   :  { %3701 = vmatmul.mubr.msk.bf16.vlgmr.msra.gmra.mxu0 %vm426_vm6, %v2336_v34  ;;  %v3949_v34 = vld [vmem:[%s4753_s2 + $0x78] sm:$0xff]  }
 0xdaa   :  { %3711 = vmatpush3.bf16.msra.mxu0 %v2440_v24  ;;  %3712 = vmatprep.mubr.msk.bf16.mxu0 %vm4065_vm1, %v4064_v3 }
 0xdab   :  { %3722 = vmatprep.subr.bf16.mxu0 %v4064_v3 }
 0xdee   :  { %v2304_v52 = vpop.xlane.xlu1 %2303 }
 0xdef   :  { %4021 = vrcp.f32 %v2304_v52 }
 0xdf2   :  { %v2307_v36 = vpop.xlane.xlu0 %2306 }
 0xdf3   :  { %4023 = vrcp.f32 %v2307_v36 }
 0xdf6   :  { %v2313_v38 = vpop.xlane.xlu0 %2312 }
 0xdf7   :  { %4025 = vrcp.f32 %v2313_v38  ;;  %v2310_v40 = vpop.xlane.xlu1 %2309 }
 0xdf8   :  { %4027 = vrcp.f32 %v2310_v40 }
 0xdfc   :  { %v4022_v41 = vpop.eup %4021 }
 0xdfd   :  { %v2330_v42 = vmul.f32 %v4022_v41, %v4006_v62 }
 0xdfe   :  { %v2319_v39 = vpop.xlane.xlu0 %2318 }
 0xdff   :  { %4029 = vrcp.f32 %v2319_v39  ;;  %v2316_v27 = vpop.xlane.xlu1 %2315  ;;  %v2338_v44 = vpack.c.bf16 %v2330_v42, %v2330_v42  ;;  %v3950_v42 = vld [vmem:[%s4753_s2 + $0x70] sm:$0xff]  }
 0xe00   :  { %v4024_v45 = vpop.eup %4023  ;;  %4031 = vrcp.f32 %v2316_v27 }
 0xe01   :  { %3713 = vmatmul.mubr.msk.bf16.vlgmr.msra.gmra.mxu0 %vm426_vm6, %v2338_v44  ;;  %v2331_v28 = vmul.f32 %v4024_v45, %v4008_v50 }
 0xe02   :  { %v3898_v6 = vpop.permute.xlu0 %3897  ;;  %3724 = vmatprep.mubr.msk.bf16.mxu0 %vm4065_vm1, %v4064_v3 }
 0xe03   :  { %v3900_v46 = vunpack.i.h.bf16 %v3898_v6  ;;  %v3899_v48 = vunpack.i.l.bf16 %v3898_v6  ;;  %v3903_v49 = vpop.permute.xlu1 %3902  ;;  %v2339_v51 = vpack.c.bf16 %v2331_v28, %v2331_v28 }
 0xe04   :  { %v4026_v22 = vpop.eup %4025  ;;  %v3904_v53 = vunpack.i.l.bf16 %v3903_v49  ;;  %v3905_v60 = vunpack.i.h.bf16 %v3903_v49 }
 0xe05   :  { %v4028_v56 = vpop.eup %4027  ;;  %v1869_v57 = vpack.c.bf16 %v3900_v46, %v3900_v46  ;;  %v1868_v58 = vpack.c.bf16 %v3899_v48, %v3899_v48  ;;  %3719 = vmatmul.mubr.msk.bf16.vlgmr.msra.gmra.mxu1 %vm426_vm6, %v2339_v51  ;;  %v2333_v2 = vmul.f32 %v4026_v22, %v4585_v0 }
 0xe06   :  { %v2332_v61 = vmul.f32 %v4028_v56, %v4587_v7  ;;  %3730 = vmatprep.mubr.msk.bf16.mxu1 %vm4065_vm1, %v4064_v3  ;;  %v1870_v62 = vpack.c.bf16 %v3904_v53, %v3904_v53  ;;  %v1871_v50 = vpack.c.bf16 %v3905_v60, %v3905_v60 }
 0xe07   :  { %v2532_v47 = vsel %vm105_vm0, %v1868_v58, 0  ;;  %v2578_v1 = vsel %vm105_vm0, %v1869_v57, 0  ;;  %v2341_v8 = vpack.c.bf16 %v2333_v2, %v2333_v2 }
 0xe08   :  { %3723 = vmatpush3.bf16.msra.mxu0 %v2532_v47  ;;  %3729 = vmatpush3.bf16.msra.mxu1 %v2578_v1  ;;  %v2340_v63 = vpack.c.bf16 %v2332_v61, %v2332_v61  ;;  %v2624_v7 = vsel %vm105_vm0, %v1870_v62, 0  ;;  %v2670_v0 = vsel %vm105_vm0, %v1871_v50, 0 }
 0xe09   :  { %3734 = vmatprep.subr.bf16.mxu0 %v4064_v3  ;;  %3740 = vmatprep.subr.bf16.mxu1 %v4064_v3 }
 0xe0b   :  { %3725 = vmatmul.mubr.msk.bf16.vlgmr.msra.gmra.mxu0 %vm426_vm6, %v2340_v63 }
 0xe0c   :  { %v4030_v11 = vpop.eup %4029  ;;  %3735 = vmatpush3.bf16.msra.mxu0 %v2624_v7  ;;  %3736 = vmatprep.mubr.msk.bf16.mxu0 %vm4065_vm1, %v4064_v3 }
 0xe0d   :  { %v4032_v14 = vpop.eup %4031  ;;  %3731 = vmatmul.mubr.msk.bf16.vlgmr.msra.gmra.mxu1 %vm426_vm6, %v2341_v8  ;;  %3746 = vmatprep.subr.bf16.mxu0 %v4064_v3  ;;  %v2335_v9 = vmul.f32 %v4030_v11, %v4593_v13 }
 0xe0e   :  { %3741 = vmatpush3.bf16.msra.mxu1 %v2670_v0  ;;  %v2334_v15 = vmul.f32 %v4032_v14, %v4595_v5  ;;  %3742 = vmatprep.mubr.msk.bf16.mxu1 %vm4065_vm1, %v4064_v3 }
 0xe0f   :  { %3754 = vmatprep.subr.bf16.mxu1 %v4064_v3  ;;  %v2343_v17 = vpack.c.bf16 %v2335_v9, %v2335_v9 }
 0xe10   :  { %v2342_v16 = vpack.c.bf16 %v2334_v15, %v2334_v15 }
 0xe13   :  { %3737 = vmatmul.mubr.msk.bf16.vlgmr.msra.gmra.mxu0 %vm426_vm6, %v2342_v16 }
 0xe14   :  { %3750 = vmatprep.mubr.msk.bf16.mxu0 %vm4065_vm1, %v4064_v3  ;;  %3747 = vmatpush3.bf16.msra.mxu0 %v3949_v34 }
 0xe15   :  { %3743 = vmatmul.mubr.msk.bf16.vlgmr.msra.gmra.mxu1 %vm426_vm6, %v2343_v17  ;;  %3748 = vmatprep.subr.bf16.mxu0 %v4064_v3 }
 0xe16   :  { %3758 = vmatprep.mubr.msk.bf16.mxu1 %vm4065_vm1, %v4064_v3 }
 0xe18   :  { %3749 = vmatpush3.bf16.msra.mxu0 %v3950_v42 }
 0xe19   :  { %3762 = vmatprep.subr.bf16.mxu0 %v4064_v3 }
 0xe4a   :  { %v2430_v5 = vpop.f32.mrf.mxu1 }
 0xe4c   :  { %v3708_v18 = vpop.f32.mrf.mxu1 }
 0xe4e   :  { %v2433_v23 = vpop.f32.mrf.mxu1 }
 0xe50   :  { %v3709_v21 = vpop.f32.mrf.mxu1 }
 0xe69   :  { %v2384_v25 = vpop.f32.mrf.mxu0 }
 0xe6b   :  { %v3702_v13 = vpop.f32.mrf.mxu0 }
 0xe6d   :  { %v2387_v26 = vpop.f32.mrf.mxu0 }
 0xe6f   :  { %v3703_v29 = vpop.f32.mrf.mxu0 }
 0xec1   :  { %v2476_v30 = vpop.f32.mrf.mxu0 }
 0xec3   :  { %v3714_v31 = vpop.f32.mrf.mxu0 }
 0xec5   :  { %v2479_v32 = vpop.f32.mrf.mxu0  ;;  %v2522_v33 = vpop.f32.mrf.mxu1 }
 0xec6   :  { %v3906_v24 = vpack.i.bf16 %v2522_v33, %v2476_v30 }
 0xec7   :  { %v3715_v52 = vpop.f32.mrf.mxu0  ;;  %v3720_v36 = vpop.f32.mrf.mxu1 }
 0xec8   :  { %3907 = vrot.lane.b32.xlu1 %v3906_v24, %s4069_s9 }
 0xec9   :  { %v2525_v38 = vpop.f32.mrf.mxu1 }
 0xecb   :  { %v3721_v40 = vpop.f32.mrf.mxu1  ;;  %v2568_v41 = vpop.f32.mrf.mxu0 }
 0xecd   :  { %v3726_v39 = vpop.f32.mrf.mxu0  ;;  %v2614_v27 = vpop.f32.mrf.mxu1 }
 0xece   :  { %v3911_v44 = vpack.i.bf16 %v2614_v27, %v2568_v41  ;;  %v3952_v39 = vld [vmem:[%s4754_s3 + $0x30] sm:$0xff]   ;;  %v3953_v27 = vld [vmem:[%s4754_s3 + $0x58] sm:$0xff]  }
 0xecf   :  { %v2571_v45 = vpop.f32.mrf.mxu0  ;;  %v3732_v28 = vpop.f32.mrf.mxu1 }
 0xed0   :  { %3912 = vrot.lane.b32.xlu0 %v3911_v44, %s4070_s12 }
 0xed1   :  { %v3727_v6 = vpop.f32.mrf.mxu0  ;;  %v2617_v46 = vpop.f32.mrf.mxu1 }
 0xed3   :  { %v3733_v48 = vpop.f32.mrf.mxu1  ;;  %v2660_v49 = vpop.f32.mrf.mxu0 }
 0xed5   :  { %v3738_v51 = vpop.f32.mrf.mxu0  ;;  %v2706_v22 = vpop.f32.mrf.mxu1 }
 0xed6   :  { %v3916_v53 = vpack.i.bf16 %v2706_v22, %v2660_v49  ;;  %v2839_v22 = vrot.slane %v4493_v12, %v1396_v54  ;;  %v3954_v54 = vld [vmem:[%s4754_s3 + $0x50] sm:$0xff]  }
 0xed7   :  { %v2663_v56 = vpop.f32.mrf.mxu0  ;;  %v3744_v57 = vpop.f32.mrf.mxu1 }
 0xed8   :  { %3917 = vrot.lane.b32.xlu1 %v3916_v53, %s4071_s13 }
 0xed9   :  { %v3739_v58 = vpop.f32.mrf.mxu0  ;;  %v2709_v60 = vpop.f32.mrf.mxu1 }
 0xeda   :  { %v2845_v58 = vrot.slane %v4493_v12, %v1402_v59  ;;  %v3955_v59 = vld [vmem:[%s4754_s3 + $0x48] sm:$0xff]  }
 0xedb   :  { %v3745_v61 = vpop.f32.mrf.mxu1 }
 0xf3a   :  { %v3908_v62 = vpop.permute.xlu1 %3907 }
 0xf3b   :  { %v3910_v1 = vunpack.i.h.bf16 %v3908_v62  ;;  %v3909_v2 = vunpack.i.l.bf16 %v3908_v62 }
 0xf3d   :  { %v2737_v8 = vsel %vm426_vm6, %v2430_v5, %v3910_v1  ;;  %v2736_v11 = vsel %vm426_vm6, %v2384_v25, %v3909_v2  ;;  %v2751_v5 = vrot.slane %v4493_v12, %v1307_v19  ;;  %v3956_v1 = vld [vmem:[%s4754_s3 + $0x40] sm:$0xff]   ;;  %v2865_v2 = vrot.slane %v4493_v12, %v1421_v10 }
 0xf42   :  { %v3913_v47 = vpop.permute.xlu0 %3912 }
 0xf43   :  { %v3915_v50 = vunpack.i.h.bf16 %v3913_v47  ;;  %v3914_v63 = vunpack.i.l.bf16 %v3913_v47 }
 0xf45   :  { %v2739_v15 = vsel %vm1293_vm7, %v2737_v8, %v3915_v50  ;;  %v2738_v9 = vsel %vm1293_vm7, %v2736_v11, %v3914_v63 }
 0xf4a   :  { %v3918_v7 = vpop.permute.xlu1 %3917 }
 0xf4b   :  { %v3920_v14 = vunpack.i.h.bf16 %v3918_v7  ;;  %v3919_v0 = vunpack.i.l.bf16 %v3918_v7 }
 0xf4d   :  { %v2741_v16 = vsel %vm1296_vm8, %v2739_v15, %v3920_v14  ;;  %v2740_v17 = vsel %vm1296_vm8, %v2738_v9, %v3919_v0 }
 0xf4e   :  { %v2742_v18 = vpack.c.bf16 %v2741_v16, %v2740_v17  ;;  %v2928_v16 = vrot.slane %v4493_v12, %v1484_v20 }
 0xf50   :  { %3751 = vmatmul.mubr.msk.bf16.vlgmr.msra.gmra.mxu0 %vm173_vm5, %v2742_v18 }
 0xf51   :  { %3770 = vmatprep.mubr.msk.bf16.mxu0 %vm4065_vm1, %v4064_v3  ;;  %3763 = vmatpush3.bf16.msra.mxu0 %v3953_v27 }
 0xf52   :  { %3764 = vmatprep.subr.bf16.mxu0 %v4064_v3 }
 0xf55   :  { %3765 = vmatpush3.bf16.msra.mxu0 %v3954_v54 }
 0xf56   :  { %3766 = vmatprep.subr.bf16.mxu0 %v4064_v3 }
 0xf59   :  { %3767 = vmatpush3.bf16.msra.mxu0 %v3955_v59 }
 0xf5a   :  { %3768 = vmatprep.subr.bf16.mxu0 %v4064_v3 }
 0xf5d   :  { %3769 = vmatpush3.bf16.msra.mxu0 %v3956_v1 }
0x1010   :  { %v2801_v23 = vpop.f32.mrf.mxu0 }
0x1011   :  { %v2802_v21 = vadd.f32 %v2801_v23, %v2751_v5 }
0x1012   :  { %v3752_v25 = vpop.f32.mrf.mxu0 }
0x1013   :  { %v2808_v13 = vadd.f32 %v2802_v21, %v4467_v55 }
0x1014   :  { %v2804_v26 = vpop.f32.mrf.mxu0 }
0x1015   :  { %v2805_v29 = vadd.f32 %v2804_v26, %v2751_v5  ;;  %v2810_v30 = vsel %vm173_vm5, %v2808_v13, 0.0 }
0x1016   :  { %2811 = vadd.xlane.f32.xlu0 %v2810_v30  ;;  %v3753_v31 = vpop.f32.mrf.mxu0 }
0x1017   :  { %v2809_v32 = vadd.f32 %v2805_v29, %v4469_v4  ;;  %v3951_v4 = vld [vmem:[%s4754_s3 + $0x38] sm:$0xff]  }
0x1018   :  { %3755 = vmatpush3.bf16.msra.mxu1 %v3951_v4 }
0x1019   :  { %v2813_v33 = vsel %vm173_vm5, %v2809_v32, 0.0  ;;  %3756 = vmatprep.subr.bf16.mxu1 %v4064_v3 }
0x101a   :  { %2814 = vadd.xlane.f32.xlu1 %v2813_v33 }
0x101c   :  { %3757 = vmatpush3.bf16.msra.mxu1 %v3952_v39  ;;  %v3267_v39 = vld [vmem:[%s4756_s5 + $0x18] sm:$0xff] }
0x101d   :  { %3774 = vmatprep.subr.bf16.mxu1 %v4064_v3  ;;  %v3028_v27 = vrot.slane %v3267_v39, %v4214_v43 }
0x109f   :  { %v2812_v34 = vpop.xlane.xlu0 %2811 }
0x10a0   :  { %v2816_v24 = vmul.f32 0.03125, %v2812_v34 }
0x10a2   :  { %v2818_v52 = vsub.f32 %v2808_v13, %v2816_v24 }
0x10a3   :  { %v2815_v19 = vpop.xlane.xlu1 %2814 }
0x10a4   :  { %v2817_v36 = vmul.f32 0.03125, %v2815_v19  ;;  %v2820_v38 = vmul.f32 %v2818_v52, %v2818_v52  ;;  %v3957_v19 = vld [vmem:[%s4755_s4 + $0x8] sm:$0xff]  }
0x10a6   :  { %v2819_v40 = vsub.f32 %v2809_v32, %v2817_v36  ;;  %v2822_v55 = vsel %vm173_vm5, %v2820_v38, 0.0  ;;  %v3958_v36 = vld [vmem:[%s4755_s4] sm:$0xff]  }
0x10a7   :  { %2823 = vadd.xlane.f32.xlu0 %v2822_v55 }
0x10a8   :  { %v2821_v41 = vmul.f32 %v2819_v40, %v2819_v40 }
0x10aa   :  { %v2825_v42 = vsel %vm173_vm5, %v2821_v41, 0.0 }
0x10ab   :  { %2826 = vadd.xlane.f32.xlu0 %v2825_v42 }
0x1130   :  { %v2824_v44 = vpop.xlane.xlu0 %2823 }
0x1131   :  { %v2828_v45 = vmul.f32 0.03125, %v2824_v44 }
0x1133   :  { %v2830_v28 = vadd.f32 1e-06, %v2828_v45  ;;  %v3034_v45 = vrot.slane %v3267_v39, %v4204_v37 }
0x1134   :  { %v2827_v6 = vpop.xlane.xlu0 %2826 }
0x1135   :  { %4033 = vrsqrt.f32 %v2830_v28  ;;  %v2829_v46 = vmul.f32 0.03125, %v2827_v6 }
0x1137   :  { %v2831_v48 = vadd.f32 1e-06, %v2829_v46 }
0x1139   :  { %4035 = vrsqrt.f32 %v2831_v48 }
0x1142   :  { %v4034_v49 = vpop.eup %4033 }
0x1143   :  { %v2834_v51 = vmul.f32 %v4034_v49, %v2818_v52 }
0x1145   :  { %v2840_v57 = vmul.f32 %v2839_v22, %v2834_v51 }
0x1146   :  { %v4036_v53 = vpop.eup %4035 }
0x1147   :  { %v2835_v56 = vmul.f32 %v4036_v53, %v2819_v40  ;;  %v2846_v61 = vadd.f32 %v2845_v58, %v2840_v57 }
0x1149   :  { %v2841_v60 = vmul.f32 %v2839_v22, %v2835_v56 }
0x114b   :  { %v2847_v62 = vadd.f32 %v2845_v58, %v2841_v60 }
0x114d   :  { %v2861_v47 = vpack.c.bf16 %v2847_v62, %v2846_v61 }
0x114f   :  { %3759 = vmatmul.mubr.msk.bf16.vlgmr.msra.gmra.mxu1 %vm173_vm5, %v2861_v47 }
0x1150   :  { %3778 = vmatprep.mubr.msk.bf16.mxu1 %vm4065_vm1, %v4064_v3  ;;  %3775 = vmatpush3.bf16.msra.mxu1 %v3957_v19 }
0x1151   :  { %3776 = vmatprep.subr.bf16.mxu1 %v4064_v3 }
0x1154   :  { %3777 = vmatpush3.bf16.msra.mxu1 %v3958_v36 }
0x1155   :  { %3782 = vmatprep.subr.bf16.mxu1 %v4064_v3 }
0x120f   :  { %v2915_v50 = vpop.f32.mrf.mxu1 }
0x1210   :  { %v2916_v7 = vadd.f32 %v2915_v50, %v2865_v2 }
0x1211   :  { %v3760_v63 = vpop.f32.mrf.mxu1 }
0x1212   :  { %v2922_v0 = vmax.f32 %v2916_v7, 0.0 }
0x1213   :  { %v2918_v8 = vpop.f32.mrf.mxu1 }
0x1214   :  { %v2919_v11 = vadd.f32 %v2918_v8, %v2865_v2 }
0x1215   :  { %v3761_v14 = vpop.f32.mrf.mxu1 }
0x1216   :  { %v2923_v15 = vmax.f32 %v2919_v11, 0.0 }
0x1218   :  { %v2924_v9 = vpack.c.bf16 %v2923_v15, %v2922_v0  ;;  %v3959_v0 = vld [vmem:[%s4755_s4 + $0x18] ss:$0 sps:$4 sm:$0x33]  }
0x121a   :  { %3771 = vmatmul.mubr.msk.bf16.vlgmr.msra.gmra.mxu0 %vm1510_vm9, %v2924_v9 }
0x12da   :  { %v2990_v17 = vpop.f32.mrf.mxu0 }
0x12db   :  { %v2991_v18 = vadd.f32 %v2990_v17, %v2928_v16 }
0x12dc   :  { %v3772_v5 = vpop.f32.mrf.mxu0 }
0x12dd   :  { %v2997_v23 = vadd.f32 %v2991_v18, %v2846_v61  ;;  %v3151_v18 = vsel %vm3149_vm11, %v3959_v0, 0  ;;  %v3960_v5 = vld [vmem:[%s4755_s4 + $0x10] sm:$0xff]   ;;  %s4041_s4 = scalar_lea.vmem %s3202_s30, 32 }
0x12de   :  { %v2993_v10 = vpop.f32.mrf.mxu0  ;;  %p4042_p0 = scmp.ne.s32.totalorder %s3202_s30, %s4041_s4  ;;  %p4047_p2 = scmp.lt.s32.totalorder %s4041_s4, %s4041_s4 }
0x12df   :  { %v2994_v21 = vadd.f32 %v2993_v10, %v2928_v16  ;;  %v2999_v25 = vsel %vm173_vm5, %v2997_v23, 0.0 }
0x12e0   :  { %3000 = vadd.xlane.f32.xlu1 %v2999_v25  ;;  %v3773_v13 = vpop.f32.mrf.mxu0  ;;  %p4048_p3 = por %p4047_p2, %p4046_p1 }
0x12e1   :  { %v2998_v26 = vadd.f32 %v2994_v21, %v2847_v62 }
0x12e2   :  { %p4049_p4 = pnand %p4048_p3, %p4042_p0 }
0x12e3   :  { %v3002_v29 = vsel %vm173_vm5, %v2998_v26, 0.0 }
0x12e4   :  { %3003 = vadd.xlane.f32.xlu0 %v3002_v29 }
0x1369   :  { %v3001_v30 = vpop.xlane.xlu1 %3000 }
0x136a   :  { %v3005_v31 = vmul.f32 0.03125, %v3001_v30 }
0x136c   :  { %v3007_v32 = vsub.f32 %v2997_v23, %v3005_v31  ;;  %v3332_v23 = vld [vmem:[%s4756_s5 + $0x20] sm:$0xff] }
0x136d   :  { %v3004_v35 = vpop.xlane.xlu0 %3003  ;;  %v3068_v10 = vrot.slane %v3332_v23, %v4214_v43 }
0x136e   :  { %v3006_v33 = vmul.f32 0.03125, %v3004_v35  ;;  %v3009_v20 = vmul.f32 %v3007_v32, %v3007_v32 }
0x1370   :  { %v3008_v12 = vsub.f32 %v2998_v26, %v3006_v33  ;;  %v3011_v34 = vsel %vm173_vm5, %v3009_v20, 0.0 }
0x1371   :  { %3012 = vadd.xlane.f32.xlu1 %v3011_v34 }
0x1372   :  { %v3010_v24 = vmul.f32 %v3008_v12, %v3008_v12 }
0x1374   :  { %v3014_v52 = vsel %vm173_vm5, %v3010_v24, 0.0 }
0x1375   :  { %3015 = vadd.xlane.f32.xlu0 %v3014_v52 }
0x13fa   :  { %v3013_v38 = vpop.xlane.xlu1 %3012 }
0x13fb   :  { %v3017_v40 = vmul.f32 0.03125, %v3013_v38 }
0x13fd   :  { %v3019_v55 = vadd.f32 1e-06, %v3017_v40 }
0x13fe   :  { %v3016_v41 = vpop.xlane.xlu0 %3015 }
0x13ff   :  { %4037 = vrsqrt.f32 %v3019_v55  ;;  %v3018_v42 = vmul.f32 0.03125, %v3016_v41 }
0x1401   :  { %v3020_v4 = vadd.f32 1e-06, %v3018_v42 }
0x1403   :  { %4039 = vrsqrt.f32 %v3020_v4 }
0x140c   :  { %v4038_v44 = vpop.eup %4037 }
0x140d   :  { %v3023_v28 = vmul.f32 %v4038_v44, %v3007_v32 }
0x140f   :  { %v3029_v6 = vmul.f32 %v3028_v27, %v3023_v28 }
0x1410   :  { %v4040_v46 = vpop.eup %4039 }
0x1411   :  { %v3035_v48 = vadd.f32 %v3034_v45, %v3029_v6  ;;  %v3024_v49 = vmul.f32 %v4040_v46, %v3008_v12 }
0x1413   :  { %v3037_v51 = vsel %vm173_vm5, %v3035_v48, 0.0  ;;  %v3030_v22 = vmul.f32 %v3028_v27, %v3024_v49 }
0x1414   :  { %v3038_v53 = vrot.slane %v3037_v51, 4 }
0x1415   :  { %v3036_v56 = vadd.f32 %v3034_v45, %v3030_v22 }
0x1416   :  { %v3039_v57 = vadd.f32 %v3038_v53, %v3037_v51 }
0x1417   :  { %v3044_v58 = vsel %vm173_vm5, %v3036_v56, 0.0 }
0x1418   :  { %v3045_v60 = vrot.slane %v3044_v58, 4  ;;  %v3040_v61 = vrot.slane %v3039_v57, 2 }
0x141a   :  { %v3046_v62 = vadd.f32 %v3045_v60, %v3044_v58  ;;  %v3041_v47 = vadd.f32 %v3040_v61, %v3039_v57 }
0x141c   :  { %v3042_v54 = vrot.slane %v3041_v47, 1  ;;  %v3047_v59 = vrot.slane %v3046_v62, 2 }
0x141e   :  { %v3043_v1 = vadd.f32 %v3042_v54, %v3041_v47  ;;  %v3048_v2 = vadd.f32 %v3047_v59, %v3046_v62 }
0x1420   :  { %v3049_v50 = vrot.slane %v3048_v2, 1  ;;  %v3052_v63 = vmul.f32 0.125, %v3043_v1 }
0x1422   :  { %v3050_v7 = vadd.f32 %v3049_v50, %v3048_v2  ;;  %v3063_v11 = vpack.c.bf16 %v3052_v63, %v3052_v63 }
0x1424   :  { %v3053_v8 = vmul.f32 0.125, %v3050_v7  ;;  %v3071_v15 = vunpack.c.l.b16 %v3063_v11 }
0x1426   :  { %v3064_v14 = vpack.c.bf16 %v3053_v8, %v3053_v8 }
0x1428   :  { %v3072_v9 = vunpack.c.l.b16 %v3064_v14 }
0x142a   :  { %v3074_v16 = vsel %vm3073_vm10, %v3072_v9, %v3071_v15 }
0x142b   :  { %v3075_v17 = vpack.c.b16 %v3074_v16, %v3074_v16 }
0x142d   :  { %3779 = vmatmul.mubr.msk.bf16.vlgmr.msra.gmra.mxu1 %vm173_vm5, %v3075_v17 }
0x142e   :  { %3783 = vmatpush3.bf16.msra.mxu1 %v3151_v18  ;;  %3786 = vmatprep.mubr.msk.bf16.mxu1 %vm4065_vm1, %v4064_v3 }
0x142f   :  { %3784 = vmatprep.subr.bf16.mxu1 %v4064_v3  ;;  %v3135_v3 = vrot.slane %v3332_v23, %v4204_v37 }
0x1432   :  { %3785 = vmatpush3.bf16.msra.mxu1 %v3960_v5 }
0x14ed   :  { %v3125_v21 = vpop.f32.mrf.mxu1 }
0x14ee   :  { %v3126_v25 = vadd.f32 %v3125_v21, %v3068_v10 }
0x14ef   :  { %v3780_v13 = vpop.f32.mrf.mxu1 }
0x14f0   :  { %v3131_v26 = vpack.c.bf16 %v3126_v25, %v3126_v25 }
0x14f1   :  { %v3128_v29 = vpop.f32.mrf.mxu1 }
0x14f2   :  { %3787 = vmatmul.mubr.msk.bf16.vlgmr.msra.gmra.mxu1 %vm3145_vm12, %v3131_v26 }
0x14f3   :  { %v3781_v30 = vpop.f32.mrf.mxu1 }
0x15b2   :  { %v3187_v31 = vpop.f32.mrf.mxu1 }
0x15b3   :  { %v3188_v32 = vadd.f32 %v3187_v31, %v3135_v3 }
0x15b4   :  { %v3788_v35 = vpop.f32.mrf.mxu1 }
0x15b5   :  { %3194 = vst.msk [vmem:[#allocation2] sm:$0x3] %vm3193_vm13, %v3188_v32 }
0x15b6   :  { %v3190_v33 = vpop.f32.mrf.mxu1 }
0x15b7   :  { %4052 = shalt.err (!%p4049_p4)
}
0x15b8   :  { %3204 = dma.vmem_to_hbm [thread:$0]  %s3202_s30, 32, %s4757_s6, [#allocation3]   ;;  %v3789_v37 = vpop.f32.mrf.mxu1 }
0x15b9   :  { %4061 = dma.done.wait [#allocation3], 32  }
0x15ba   :  { %4062 = vsyncadd [#allocation3], 4294967264 }
0x15bb   :  { %3208 = vsyncpa [#allocation3], 1 }

</bundles_post_ra>
